<compile_context>
chip_gen: v6e
topology: v6e:2x2x1
jax: 0.10.0
libtpu: 0.0.40
codegen_flags: <defaults>
</compile_context>

<pallas_src>
from functools import partial

import numpy as np

import jax
import jax.numpy as jnp
from jax.experimental import pallas as pl
from jax.experimental.pallas import tpu as pltpu


R_CAP_ROWS = 2048                 # target per-step pair rows (review: ~1-4K)
VMEM_LIMIT_BYTES = 48 * 1024 * 1024   # raise v5e's 16MiB default; safe on v7x


# ----------------------------------------------------------------------------
# Kernel
# ----------------------------------------------------------------------------
def make_output_kernel(tile_i, L, B, H2, Gp, NL, coeff):
    R = tile_i * B * L  # pair rows per grid step, ordered (i_local, b, j)
    bf16 = jnp.bfloat16
    f32 = jnp.float32

    def kernel(prei_ref, prej_ref, pair_ref, offs_ref, wr_ref, wh_ref, bh_ref,
               wfrow_ref, fbout_ref, eacc_ref, facc_ref):
        @pl.when(pl.program_id(1) == 0)
        def _():
            eacc_ref[...] = jnp.zeros_like(eacc_ref)
            facc_ref[...] = jnp.zeros_like(facc_ref)

        # --- packed per-pair slab: [d, m_i*m_j, vx, vy, vz, 0, 0, 0] ---------
        pair = pair_ref[...]                                    # (R, 8) f32
        d = pair[:, 0:1]
        ent = pair[:, 1:2]
        vec = pair[:, 2:5]

        # --- RBF contribution to the fused first-layer pre-activation -------
        # exp(coeff*(d-off)^2) @ (rbf_w @ W_in_rbf)  : (R, Gp) x (Gp, 2H), bf16 MXU
        # TODO(synk): only G of the Gp=128 exp lanes are meaningful; if EUP
        # becomes the binding slot, pack multiple rows' gaussians per vreg.
        rbf = jnp.exp(coeff * (d - offs_ref[...]) ** 2)         # (R, Gp) f32
        pre = jnp.dot(rbf.astype(bf16), wr_ref[...],
                      preferred_element_type=f32)               # (R, 2H) f32

        # --- add precomputed per-atom i / j projections (broadcast-add) -----
        pre = pre.reshape(tile_i, B, L, H2)
        pre = pre + prei_ref[...][:, :, None, :].astype(f32)    # x_i @ W_i
        pre = pre + prej_ref[...][None].astype(f32)             # x_j @ W_j + biases
        h = jax.nn.silu(pre).reshape(R, H2)                     # f32

        # --- fused residual trunk: block-diag(e_wh, f_wh), 2H = 128 lanes ---
        for k in range(NL):                                     # static unroll
            h = h + jax.nn.silu(
                jnp.dot(h.astype(bf16), wh_ref[k],
                        preferred_element_type=f32) + bh_ref[k])

        # --- mask once, reuse for both heads: ent[r] = m_i * m_j ------------
        h_m = h * ent                                           # (R, 2H) f32

        # --- energy head: reduce-before-project (projection in wrapper) -----
        eacc_ref[...] += h_m.reshape(tile_i, B, L, H2).sum(axis=(0, 2))[None]

        # --- forces head: N=1 projection on the VPU/XLU (not the MXU) -------
        f_s = (jnp.sum(h_m * wfrow_ref[...], axis=-1, keepdims=True)
               + ent * fbout_ref[...])                          # (R, 1)
        fvec = f_s * vec                                        # (R, 3)
        facc_ref[...] += fvec.reshape(tile_i, B * L, 3).sum(axis=0, keepdims=True)

    return kernel


# ----------------------------------------------------------------------------
# tile selection: cap per-step rows, keep >=2 grid steps when possible
# ----------------------------------------------------------------------------
def _pick_tile_i(L, B, r_cap):
    rows_per_i = B * L
    divs = [d for d in range(1, L + 1) if L % d == 0]
    cands = [d for d in divs if (d * rows_per_i) % 8 == 0]
    if not cands:
        return L                       # full block: always spec-legal
    within = [d for d in cands if d * rows_per_i <= r_cap]
    if not within:
        return min(cands)              # smallest legal block (exceeds cap)
    multi = [d for d in within if L // d >= 2]
    return max(multi) if multi else max(within)


# ----------------------------------------------------------------------------
# Wrapper (jitted dense path): parameter folding, layout, final projections
# ----------------------------------------------------------------------------
@partial(jax.jit, static_argnames=("rbf_radius", "avg_len", "tile_i", "r_cap"))
def _forward_dense(x, dist, vec_hat, mask, params, *,
                   rbf_radius, avg_len, tile_i, r_cap):
    L, B, D = x.shape
    G = params["offsets"].shape[-1]
    e, f = params["energy"], params["forces"]
    H = e["win"].shape[-1]
    NL = e["wh"].shape[0]
    H2 = 2 * H

    if tile_i is None:
        tile_i = _pick_tile_i(L, B, r_cap)
    assert L % tile_i == 0
    R = tile_i * B * L
    assert R % 8 == 0 or tile_i == L
    num_tiles = L // tile_i
    num_groups = 2 if (num_tiles % 2 == 0 and num_tiles >= 2) else 1
    tpg = num_tiles // num_groups      # tiles per group (inner "arbitrary" axis)

    coeff = -0.5 / (rbf_radius / (G - 1)) ** 2
    Gp = ((G + 127) // 128) * 128      # pad gaussian count to lane width
    f32, bf16 = jnp.float32, jnp.bfloat16

    # ---- fold / fuse parameters ---------------------------------------------
    def col_cat(a, b):
        return jnp.concatenate([a, b], axis=-1)

    W_i = col_cat(e["win"][:D], f["win"][:D])               # (D, 2H)
    W_j = col_cat(e["win"][D:2 * D], f["win"][D:2 * D])     # (D, 2H)
    W_r = col_cat(e["win"][2 * D:], f["win"][2 * D:])       # (D, 2H)
    b_in = col_cat(e["bin"], f["bin"])                      # (1, 2H)
    wr_fold = params["rbf_w"] @ W_r                         # (G, 2H) folded RBF
    b_fold = params["rbf_b"] @ W_r + b_in                   # (1, 2H) folded biases
    wr_pad = jnp.zeros((Gp, H2), f32).at[:G].set(wr_fold).astype(bf16)
    offs_pad = jnp.zeros((1, Gp), f32).at[:, :G].set(params["offsets"][None, :])

    # per-atom first-layer contributions: O(L*B*D*H) instead of O(L^2*B*D*H)
    prei = jnp.einsum("lbd,dh->lbh", x, W_i).astype(bf16)             # (L, B, 2H)
    prej = jnp.transpose(jnp.einsum("lbd,dh->lbh", x, W_j) + b_fold,
                         (1, 0, 2)).astype(bf16)                      # (B, L, 2H)

    # block-diagonal fused hidden weights -> one 128-lane-wide trunk (bf16)
    wh_f = (jnp.zeros((NL, H2, H2), f32)
            .at[:, :H, :H].set(e["wh"]).at[:, H:, H:].set(f["wh"])).astype(bf16)
    bh_f = jnp.concatenate([e["bh"], f["bh"]], axis=-1)               # (NL, 1, 2H)
    wf_row = jnp.concatenate([jnp.zeros((1, H), f32),
                              f["wout"].reshape(1, H)], axis=-1)      # (1, 2H)
    fbout = f["bout"].reshape(1, 1)

    # ---- packed per-pair slab, rows ordered (i, b, j): [d, m, vx, vy, vz, pad]
    mT = mask.T.astype(f32)                                           # (L, B)
    ent = mT[:, None, :] * mT[None, :, :]                             # (i, j, b)
    pack = jnp.concatenate(
        [jnp.transpose(dist, (0, 2, 1))[..., None],                   # d
         jnp.transpose(ent, (0, 2, 1))[..., None],                    # m_i*m_j
         jnp.transpose(vec_hat, (0, 2, 1, 3)),                        # vx,vy,vz
         jnp.zeros((L, B, L, 3), f32)], axis=-1).reshape(L * B * L, 8)

    kernel = make_output_kernel(tile_i, L, B, H2, Gp, NL, coeff)

    def full(shape):
        nd = len(shape)
        return pl.BlockSpec(shape, lambda g, i, _nd=nd: (0,) * _nd)

    # TODO(synk): mark the grid-invariant specs below pipeline_mode=pl.Buffered(1)
    # once single-buffering of constant-index blocks is confirmed on all targets.
    in_specs = [
        pl.BlockSpec((tile_i, B, H2), lambda g, i: (g * tpg + i, 0, 0)),  # prei
        full((B, L, H2)),                                                 # prej
        pl.BlockSpec((R, 8), lambda g, i: (g * tpg + i, 0)),              # pair slab
        full((1, Gp)), full((Gp, H2)),                                    # rbf
        full((NL, H2, H2)), full((NL, 1, H2)),                            # trunk
        full((1, H2)), full((1, 1)),                                      # forces out
    ]
    out_specs = [pl.BlockSpec((1, B, H2), lambda g, i: (g, 0, 0)),
                 pl.BlockSpec((1, B * L, 3), lambda g, i: (g, 0, 0))]

    eacc, facc = pl.pallas_call(
        kernel,
        grid=(num_groups, tpg),
        in_specs=in_specs,
        out_specs=out_specs,
        out_shape=[jax.ShapeDtypeStruct((num_groups, B, H2), f32),
                   jax.ShapeDtypeStruct((num_groups, B * L, 3), f32)],
        compiler_params=pltpu.CompilerParams(
            dimension_semantics=("parallel", "arbitrary"),
            vmem_limit_bytes=VMEM_LIMIT_BYTES),
    )(prei, prej, pack, offs_pad, wr_pad, wh_f, bh_f, wf_row, fbout)

    # Energy: project the accumulated masked hidden sum (reduce-then-project).
    n_valid = mask.sum(axis=1).astype(f32)
    count = (n_valid ** 2)[:, None]                                   # (B, 1)
    eacc_sum = eacc.sum(axis=0)                                       # (B, 2H)
    energy = (eacc_sum[:, :H] @ e["wout"] + count * e["bout"]) / avg_len ** 2
    forces_dense = facc.sum(axis=0).reshape(B, L, 3) / avg_len        # (B, L, 3)
    return energy, forces_dense


def output_module_forward(x, dist, vec_hat, mask, params, *,
                          rbf_radius=12.0, avg_len=60.0, tile_i=None,
                          r_cap=R_CAP_ROWS):
    energy, forces_dense = _forward_dense(
        x, dist, vec_hat, mask, params,
        rbf_radius=rbf_radius, avg_len=avg_len, tile_i=tile_i, r_cap=r_cap)
    # TODO(synk): dynamic-shape boolean gather kept eager (outside jit); callers
    # wanting a fully-jittable path should consume (forces_dense, mask) directly.
    forces = forces_dense[mask]
    return energy, forces


# ----------------------------------------------------------------------------
# Pure-JAX reference (mirrors the PyTorch forward semantics)
# ----------------------------------------------------------------------------
def reference_forward(x, dist, vec_hat, mask, params, *,
                      rbf_radius=12.0, avg_len=60.0):
    L, B, D = x.shape
    offs = params["offsets"]
    G = offs.shape[0]
    coeff = -0.5 / (rbf_radius / (G - 1)) ** 2
    rbf = jnp.exp(coeff * (dist[..., None] - offs) ** 2)            # (L, L, B, G)
    rbf_emb = rbf @ params["rbf_w"] + params["rbf_b"]               # (L, L, B, D)
    xi = jnp.broadcast_to(x[:, None], (L, L, B, D))
    xj = jnp.broadcast_to(x[None, :], (L, L, B, D))
    feat = jnp.concatenate([xi, xj, rbf_emb], axis=-1)

    def resmlp(fin, p):
        h = jax.nn.silu(fin @ p["win"] + p["bin"])
        for k in range(p["wh"].shape[0]):
            h = h + jax.nn.silu(h @ p["wh"][k] + p["bh"][k])
        return h @ p["wout"] + p["bout"]

    e_pairs = resmlp(feat, params["energy"])                        # (L, L, B, 1)
    f_pairs = resmlp(feat, params["forces"]) * vec_hat              # (L, L, B, 3)
    mT = mask.T
    entries = (mT[:, None] & mT[None, :])[..., None].astype(jnp.float32)
    energy = (e_pairs * entries).sum((0, 1)) / avg_len ** 2
    forces = (f_pairs * entries).sum(0) / avg_len
    forces = jnp.transpose(forces, (1, 0, 2))[mask]
    return energy, forces


# ----------------------------------------------------------------------------
# Deterministic synthetic parameters
# ----------------------------------------------------------------------------
def init_params(key, D, H, G, NL, rbf_radius):
    def linear(k, fan_in, fan_out):
        kw, kb = jax.random.split(k)
        lim = 1.0 / np.sqrt(fan_in)
        w = jax.random.uniform(kw, (fan_in, fan_out), jnp.float32, -lim, lim)
        b = jax.random.uniform(kb, (1, fan_out), jnp.float32, -lim, lim)
        return w, b

    def resmlp_params(k, in_dim, hidden, out_dim, nl):
        ks = jax.random.split(k, nl + 2)
        win, b_in = linear(ks[0], in_dim, hidden)
        whs, bhs = [], []
        for j in range(nl):
            w, b = linear(ks[1 + j], hidden, hidden)
            whs.append(w)
            bhs.append(b)
        wout, bout = linear(ks[-1], hidden, out_dim)
        return dict(win=win, bin=b_in, wh=jnp.stack(whs), bh=jnp.stack(bhs),
                    wout=wout, bout=bout)

    k1, k2, k3 = jax.random.split(key, 3)
    rbf_w, rbf_b = linear(k1, G, D)
    return dict(
        offsets=jnp.linspace(0.0, rbf_radius, G).astype(jnp.float32),
        rbf_w=rbf_w, rbf_b=rbf_b,
        energy=resmlp_params(k2, 3 * D, H, 1, NL),
        forces=resmlp_params(k3, 3 * D, H, 1, NL),
    )


# ----------------------------------------------------------------------------
if __name__ == "__main__":
    L, B, D, H, G, NL = 8, 2, 32, 64, 16, 3          # 2H = 128 lanes
    rbf_radius, avg_len = 12.0, 60.0

    key = jax.random.PRNGKey(0)
    kx, kd, kv, kp = jax.random.split(key, 4)
    x = jax.random.normal(kx, (L, B, D), jnp.float32)
    dist = jax.random.uniform(kd, (L, L, B), jnp.float32, minval=0.1, maxval=10.0)
    v = jax.random.normal(kv, (L, L, B, 3), jnp.float32)
    vec_hat = v / jnp.linalg.norm(v, axis=-1, keepdims=True)
    lengths = jnp.array([L, L - 3])
    mask = jnp.arange(L)[None, :] < lengths[:, None]     # (B, L) bool

    params = init_params(kp, D, H, G, NL, rbf_radius)

    energy, forces = output_module_forward(
        x, dist, vec_hat, mask, params, rbf_radius=rbf_radius, avg_len=avg_len)
    energy = jax.block_until_ready(energy)
    forces = jax.block_until_ready(forces)

    e_ref, f_ref = reference_forward(
        x, dist, vec_hat, mask, params, rbf_radius=rbf_radius, avg_len=avg_len)

    assert energy.shape == (B, 1)
    assert forces.shape == (int(mask.sum()), 3)
    # bf16 MXU operands (f32 accumulation) -> loosened tolerances vs pure f32.
    np.testing.assert_allclose(np.asarray(energy), np.asarray(e_ref),
                               rtol=5e-2, atol=3e-3)
    np.testing.assert_allclose(np.asarray(forces), np.asarray(f_ref),
                               rtol=5e-2, atol=3e-3)
    print("KERNEL_OK")
</pallas_src>

<mosaic_0001>
module attributes {stable_mosaic.version = 11 : i64} {
  func.func @kernel(%arg0: i32, %arg1: i32, %arg2: memref<4x2x128xbf16, #tpu.memory_space<vmem>>, %arg3: memref<2x8x128xbf16, #tpu.memory_space<vmem>>, %arg4: memref<64x8xf32, #tpu.memory_space<vmem>>, %arg5: memref<1x128xf32, #tpu.memory_space<vmem>>, %arg6: memref<128x128xbf16, #tpu.memory_space<vmem>>, %arg7: memref<3x128x128xbf16, #tpu.memory_space<vmem>>, %arg8: memref<3x1x128xf32, #tpu.memory_space<vmem>>, %arg9: memref<1x128xf32, #tpu.memory_space<vmem>>, %arg10: memref<1x1xf32, #tpu.memory_space<vmem>>, %arg11: memref<1x2x128xf32, #tpu.memory_space<vmem>>, %arg12: memref<1x16x3xf32, #tpu.memory_space<vmem>>) attributes {dimension_semantics = [#tpu.dimension_semantics<parallel>, #tpu.dimension_semantics<arbitrary>], iteration_bounds = array<i64: 2, 1>, scalar_prefetch = 0 : i64, scratch_operands = 0 : i64, tpu.core_type = #tpu.core_type<tc>, window_params = [{transform_indices = @transform_0, window_bounds = array<i64: 4, 2, 128>}, {pipeline_mode = #tpu.pipeline_mode<synchronous>, transform_indices = @transform_1, window_bounds = array<i64: 2, 8, 128>}, {transform_indices = @transform_2, window_bounds = array<i64: 64, 8>}, {pipeline_mode = #tpu.pipeline_mode<synchronous>, transform_indices = @transform_3, window_bounds = array<i64: 1, 128>}, {pipeline_mode = #tpu.pipeline_mode<synchronous>, transform_indices = @transform_4, window_bounds = array<i64: 128, 128>}, {pipeline_mode = #tpu.pipeline_mode<synchronous>, transform_indices = @transform_5, window_bounds = array<i64: 3, 128, 128>}, {pipeline_mode = #tpu.pipeline_mode<synchronous>, transform_indices = @transform_6, window_bounds = array<i64: 3, 1, 128>}, {pipeline_mode = #tpu.pipeline_mode<synchronous>, transform_indices = @transform_7, window_bounds = array<i64: 1, 128>}, {pipeline_mode = #tpu.pipeline_mode<synchronous>, transform_indices = @transform_8, window_bounds = array<i64: 1, 1>}, {transform_indices = @transform_9, window_bounds = array<i64: 1, 2, 128>}, {transform_indices = @transform_10, window_bounds = array<i64: 1, 16, 3>}]} {
    %c0_i32 = arith.constant 0 : i32
    %0 = arith.cmpi eq, %arg1, %c0_i32 : i32
    %1 = arith.extui %0 : i1 to i32
    %c0_i32_0 = arith.constant 0 : i32
    %2 = arith.cmpi ne, %1, %c0_i32_0 : i32
    scf.if %2 {
      %cst_55 = arith.constant 0.000000e+00 : f32
      %106 = vector.broadcast %cst_55 : f32 to vector<1x2x128xf32>
      %c0_56 = arith.constant 0 : index
      %c0_57 = arith.constant 0 : index
      %c0_58 = arith.constant 0 : index
      %107 = vector.load %arg11[%c0_56, %c0_57, %c0_58] : memref<1x2x128xf32, #tpu.memory_space<vmem>>, vector<1x2x128xf32>
      tpu.vector_store %arg11[%c0_56, %c0_57, %c0_58], %106 {strides = array<i32>} : memref<1x2x128xf32, #tpu.memory_space<vmem>>, vector<1x2x128xf32>,
      %cst_59 = arith.constant 0.000000e+00 : f32
      %108 = vector.broadcast %cst_59 : f32 to vector<1x16x3xf32>
      %c0_60 = arith.constant 0 : index
      %c0_61 = arith.constant 0 : index
      %c0_62 = arith.constant 0 : index
      %109 = vector.load %arg12[%c0_60, %c0_61, %c0_62] : memref<1x16x3xf32, #tpu.memory_space<vmem>>, vector<1x16x3xf32>
      tpu.vector_store %arg12[%c0_60, %c0_61, %c0_62], %108 {strides = array<i32>} : memref<1x16x3xf32, #tpu.memory_space<vmem>>, vector<1x16x3xf32>,
    } else {
    }
    %c0 = arith.constant 0 : index
    %c0_1 = arith.constant 0 : index
    %3 = vector.load %arg4[%c0, %c0_1] : memref<64x8xf32, #tpu.memory_space<vmem>>, vector<64x8xf32>
    %4 = vector.extract_strided_slice %3 {offsets = [0, 0], sizes = [64, 1], strides = [1, 1]} : vector<64x8xf32> to vector<64x1xf32>
    %5 = vector.extract_strided_slice %3 {offsets = [0, 1], sizes = [64, 1], strides = [1, 1]} : vector<64x8xf32> to vector<64x1xf32>
    %6 = vector.extract_strided_slice %3 {offsets = [0, 2], sizes = [64, 3], strides = [1, 1]} : vector<64x8xf32> to vector<64x3xf32>
    %c0_2 = arith.constant 0 : index
    %c0_3 = arith.constant 0 : index
    %7 = vector.load %arg5[%c0_2, %c0_3] : memref<1x128xf32, #tpu.memory_space<vmem>>, vector<1x128xf32>
    %8 = vector.broadcast %4 : vector<64x1xf32> to vector<64x128xf32>
    %9 = vector.broadcast %7 : vector<1x128xf32> to vector<64x128xf32>
    %10 = arith.subf %8, %9 : vector<64x128xf32>
    %11 = arith.mulf %10, %10 : vector<64x128xf32>
    %cst = arith.constant -7.812500e-01 : f32
    %12 = vector.broadcast %cst : f32 to vector<64x128xf32>
    %13 = arith.mulf %12, %11 : vector<64x128xf32>
    %14 = math.exp %13 : vector<64x128xf32>
    %15 = arith.truncf %14 : vector<64x128xf32> to vector<64x128xbf16>
    %c0_4 = arith.constant 0 : index
    %c0_5 = arith.constant 0 : index
    %16 = vector.load %arg6[%c0_4, %c0_5] : memref<128x128xbf16, #tpu.memory_space<vmem>>, vector<128x128xbf16>
    %cst_6 = arith.constant dense<0.000000e+00> : vector<64x128xf32>
    %17 = tpu.matmul %15, %16, %cst_6 {dimension_numbers = #tpu.dot_dimension_numbers<[1], [0], [0], [1], [0, 0, 1, 1], [], []>} : vector<64x128xbf16>, vector<128x128xbf16>, vector<64x128xf32> -> vector<64x128xf32>
    %18 = vector.shape_cast %17 : vector<64x128xf32> to vector<4x2x8x128xf32>
    %c0_7 = arith.constant 0 : index
    %c0_8 = arith.constant 0 : index
    %c0_9 = arith.constant 0 : index
    %19 = vector.load %arg2[%c0_7, %c0_8, %c0_9] : memref<4x2x128xbf16, #tpu.memory_space<vmem>>, vector<4x2x128xbf16>
    %20 = vector.shape_cast %19 : vector<4x2x128xbf16> to vector<4x2x1x128xbf16>
    %21 = arith.extf %20 : vector<4x2x1x128xbf16> to vector<4x2x1x128xf32>
    %22 = vector.broadcast %21 : vector<4x2x1x128xf32> to vector<4x2x8x128xf32>
    %23 = arith.addf %18, %22 : vector<4x2x8x128xf32>
    %c0_10 = arith.constant 0 : index
    %c0_11 = arith.constant 0 : index
    %c0_12 = arith.constant 0 : index
    %24 = vector.load %arg3[%c0_10, %c0_11, %c0_12] : memref<2x8x128xbf16, #tpu.memory_space<vmem>>, vector<2x8x128xbf16>
    %25 = vector.shape_cast %24 : vector<2x8x128xbf16> to vector<1x2x8x128xbf16>
    %26 = arith.extf %25 : vector<1x2x8x128xbf16> to vector<1x2x8x128xf32>
    %27 = vector.broadcast %26 : vector<1x2x8x128xf32> to vector<4x2x8x128xf32>
    %28 = arith.addf %23, %27 : vector<4x2x8x128xf32>
    %29 = arith.negf %28 : vector<4x2x8x128xf32>
    %30 = math.exp %29 : vector<4x2x8x128xf32>
    %cst_13 = arith.constant 1.000000e+00 : f32
    %31 = vector.broadcast %cst_13 : f32 to vector<4x2x8x128xf32>
    %32 = arith.addf %31, %30 : vector<4x2x8x128xf32>
    %33 = arith.divf %31, %32 : vector<4x2x8x128xf32>
    %34 = arith.mulf %28, %33 : vector<4x2x8x128xf32>
    %35 = vector.shape_cast %34 : vector<4x2x8x128xf32> to vector<64x128xf32>
    %36 = arith.truncf %35 : vector<64x128xf32> to vector<64x128xbf16>
    %c0_14 = arith.constant 0 : index
    %c0_15 = arith.constant 0 : index
    %c0_16 = arith.constant 0 : index
    %37 = vector.load %arg7[%c0_14, %c0_15, %c0_16] : memref<3x128x128xbf16, #tpu.memory_space<vmem>>, vector<1x128x128xbf16>
    %38 = vector.shape_cast %37 : vector<1x128x128xbf16> to vector<128x128xbf16>
    %cst_17 = arith.constant dense<0.000000e+00> : vector<64x128xf32>
    %39 = tpu.matmul %36, %38, %cst_17 {dimension_numbers = #tpu.dot_dimension_numbers<[1], [0], [0], [1], [0, 0, 1, 1], [], []>} : vector<64x128xbf16>, vector<128x128xbf16>, vector<64x128xf32> -> vector<64x128xf32>
    %c0_18 = arith.constant 0 : index
    %c0_19 = arith.constant 0 : index
    %c0_20 = arith.constant 0 : index
    %40 = vector.load %arg8[%c0_18, %c0_19, %c0_20] : memref<3x1x128xf32, #tpu.memory_space<vmem>>, vector<1x1x128xf32>
    %41 = vector.shape_cast %40 : vector<1x1x128xf32> to vector<1x128xf32>
    %42 = vector.broadcast %41 : vector<1x128xf32> to vector<64x128xf32>
    %43 = arith.addf %39, %42 : vector<64x128xf32>
    %44 = arith.negf %43 : vector<64x128xf32>
    %45 = math.exp %44 : vector<64x128xf32>
    %cst_21 = arith.constant 1.000000e+00 : f32
    %46 = vector.broadcast %cst_21 : f32 to vector<64x128xf32>
    %47 = arith.addf %46, %45 : vector<64x128xf32>
    %48 = arith.divf %46, %47 : vector<64x128xf32>
    %49 = arith.mulf %43, %48 : vector<64x128xf32>
    %50 = arith.addf %35, %49 : vector<64x128xf32>
    %51 = arith.truncf %50 : vector<64x128xf32> to vector<64x128xbf16>
    %c1 = arith.constant 1 : index
    %c0_22 = arith.constant 0 : index
    %c0_23 = arith.constant 0 : index
    %52 = vector.load %arg7[%c1, %c0_22, %c0_23] : memref<3x128x128xbf16, #tpu.memory_space<vmem>>, vector<1x128x128xbf16>
    %53 = vector.shape_cast %52 : vector<1x128x128xbf16> to vector<128x128xbf16>
    %cst_24 = arith.constant dense<0.000000e+00> : vector<64x128xf32>
    %54 = tpu.matmul %51, %53, %cst_24 {dimension_numbers = #tpu.dot_dimension_numbers<[1], [0], [0], [1], [0, 0, 1, 1], [], []>} : vector<64x128xbf16>, vector<128x128xbf16>, vector<64x128xf32> -> vector<64x128xf32>
    %c1_25 = arith.constant 1 : index
    %c0_26 = arith.constant 0 : index
    %c0_27 = arith.constant 0 : index
    %55 = vector.load %arg8[%c1_25, %c0_26, %c0_27] : memref<3x1x128xf32, #tpu.memory_space<vmem>>, vector<1x1x128xf32>
    %56 = vector.shape_cast %55 : vector<1x1x128xf32> to vector<1x128xf32>
    %57 = vector.broadcast %56 : vector<1x128xf32> to vector<64x128xf32>
    %58 = arith.addf %54, %57 : vector<64x128xf32>
    %59 = arith.negf %58 : vector<64x128xf32>
    %60 = math.exp %59 : vector<64x128xf32>
    %cst_28 = arith.constant 1.000000e+00 : f32
    %61 = vector.broadcast %cst_28 : f32 to vector<64x128xf32>
    %62 = arith.addf %61, %60 : vector<64x128xf32>
    %63 = arith.divf %61, %62 : vector<64x128xf32>
    %64 = arith.mulf %58, %63 : vector<64x128xf32>
    %65 = arith.addf %50, %64 : vector<64x128xf32>
    %66 = arith.truncf %65 : vector<64x128xf32> to vector<64x128xbf16>
    %c2 = arith.constant 2 : index
    %c0_29 = arith.constant 0 : index
    %c0_30 = arith.constant 0 : index
    %67 = vector.load %arg7[%c2, %c0_29, %c0_30] : memref<3x128x128xbf16, #tpu.memory_space<vmem>>, vector<1x128x128xbf16>
    %68 = vector.shape_cast %67 : vector<1x128x128xbf16> to vector<128x128xbf16>
    %cst_31 = arith.constant dense<0.000000e+00> : vector<64x128xf32>
    %69 = tpu.matmul %66, %68, %cst_31 {dimension_numbers = #tpu.dot_dimension_numbers<[1], [0], [0], [1], [0, 0, 1, 1], [], []>} : vector<64x128xbf16>, vector<128x128xbf16>, vector<64x128xf32> -> vector<64x128xf32>
    %c2_32 = arith.constant 2 : index
    %c0_33 = arith.constant 0 : index
    %c0_34 = arith.constant 0 : index
    %70 = vector.load %arg8[%c2_32, %c0_33, %c0_34] : memref<3x1x128xf32, #tpu.memory_space<vmem>>, vector<1x1x128xf32>
    %71 = vector.shape_cast %70 : vector<1x1x128xf32> to vector<1x128xf32>
    %72 = vector.broadcast %71 : vector<1x128xf32> to vector<64x128xf32>
    %73 = arith.addf %69, %72 : vector<64x128xf32>
    %74 = arith.negf %73 : vector<64x128xf32>
    %75 = math.exp %74 : vector<64x128xf32>
    %cst_35 = arith.constant 1.000000e+00 : f32
    %76 = vector.broadcast %cst_35 : f32 to vector<64x128xf32>
    %77 = arith.addf %76, %75 : vector<64x128xf32>
    %78 = arith.divf %76, %77 : vector<64x128xf32>
    %79 = arith.mulf %73, %78 : vector<64x128xf32>
    %80 = arith.addf %65, %79 : vector<64x128xf32>
    %81 = vector.broadcast %5 : vector<64x1xf32> to vector<64x128xf32>
    %82 = arith.mulf %80, %81 : vector<64x128xf32>
    %c0_36 = arith.constant 0 : index
    %c0_37 = arith.constant 0 : index
    %c0_38 = arith.constant 0 : index
    %83 = vector.load %arg11[%c0_36, %c0_37, %c0_38] : memref<1x2x128xf32, #tpu.memory_space<vmem>>, vector<1x2x128xf32>
    %84 = vector.shape_cast %82 : vector<64x128xf32> to vector<4x2x8x128xf32>
    %cst_39 = arith.constant dense<0.000000e+00> : vector<2x128xf32>
    %85 = vector.multi_reduction <add>, %84, %cst_39 [0, 2] : vector<4x2x8x128xf32> to vector<2x128xf32>
    %86 = vector.shape_cast %85 : vector<2x128xf32> to vector<1x2x128xf32>
    %87 = arith.addf %83, %86 : vector<1x2x128xf32>
    %c0_40 = arith.constant 0 : index
    %c0_41 = arith.constant 0 : index
    %c0_42 = arith.constant 0 : index
    %88 = vector.load %arg11[%c0_40, %c0_41, %c0_42] : memref<1x2x128xf32, #tpu.memory_space<vmem>>, vector<1x2x128xf32>
    tpu.vector_store %arg11[%c0_40, %c0_41, %c0_42], %87 {strides = array<i32>} : memref<1x2x128xf32, #tpu.memory_space<vmem>>, vector<1x2x128xf32>,
    %c0_43 = arith.constant 0 : index
    %c0_44 = arith.constant 0 : index
    %89 = vector.load %arg9[%c0_43, %c0_44] : memref<1x128xf32, #tpu.memory_space<vmem>>, vector<1x128xf32>
    %90 = vector.broadcast %89 : vector<1x128xf32> to vector<64x128xf32>
    %91 = arith.mulf %82, %90 : vector<64x128xf32>
    %cst_45 = arith.constant dense<0.000000e+00> : vector<64xf32>
    %92 = vector.multi_reduction <add>, %91, %cst_45 [1] : vector<64x128xf32> to vector<64xf32>
    %93 = vector.shape_cast %92 : vector<64xf32> to vector<64x1xf32>
    %c0_46 = arith.constant 0 : index
    %c0_47 = arith.constant 0 : index
    %94 = vector.load %arg10[%c0_46, %c0_47] : memref<1x1xf32, #tpu.memory_space<vmem>>, vector<1x1xf32>
    %95 = vector.broadcast %94 : vector<1x1xf32> to vector<64x1xf32>
    %96 = arith.mulf %5, %95 : vector<64x1xf32>
    %97 = arith.addf %93, %96 : vector<64x1xf32>
    %98 = vector.broadcast %97 : vector<64x1xf32> to vector<64x3xf32>
    %99 = arith.mulf %98, %6 : vector<64x3xf32>
    %c0_48 = arith.constant 0 : index
    %c0_49 = arith.constant 0 : index
    %c0_50 = arith.constant 0 : index
    %100 = vector.load %arg12[%c0_48, %c0_49, %c0_50] : memref<1x16x3xf32, #tpu.memory_space<vmem>>, vector<1x16x3xf32>
    %101 = vector.shape_cast %99 : vector<64x3xf32> to vector<4x16x3xf32>
    %cst_51 = arith.constant dense<0.000000e+00> : vector<16x3xf32>
    %102 = vector.multi_reduction <add>, %101, %cst_51 [0] : vector<4x16x3xf32> to vector<16x3xf32>
    %103 = vector.shape_cast %102 : vector<16x3xf32> to vector<1x16x3xf32>
    %104 = arith.addf %100, %103 : vector<1x16x3xf32>
    %c0_52 = arith.constant 0 : index
    %c0_53 = arith.constant 0 : index
    %c0_54 = arith.constant 0 : index
    %105 = vector.load %arg12[%c0_52, %c0_53, %c0_54] : memref<1x16x3xf32, #tpu.memory_space<vmem>>, vector<1x16x3xf32>
    tpu.vector_store %arg12[%c0_52, %c0_53, %c0_54], %104 {strides = array<i32>} : memref<1x16x3xf32, #tpu.memory_space<vmem>>, vector<1x16x3xf32>,
    return
  }
  func.func @transform_0(%arg0: i32, %arg1: i32) -> (i32, i32, i32) {
    %c1_i32 = arith.constant 1 : i32
    %0 = arith.muli %arg0, %c1_i32 : i32
    %1 = arith.addi %0, %arg1 : i32
    %c0_i32 = arith.constant 0 : i32
    %c0_i32_0 = arith.constant 0 : i32
    %c0_i32_1 = arith.constant 0 : i32
    return %1, %c0_i32, %c0_i32_0 : i32, i32, i32
  }
  func.func @transform_1(%arg0: i32, %arg1: i32) -> (i32, i32, i32) {
    %c0_i32 = arith.constant 0 : i32
    %c0_i32_0 = arith.constant 0 : i32
    %c0_i32_1 = arith.constant 0 : i32
    %c0_i32_2 = arith.constant 0 : i32
    return %c0_i32, %c0_i32_0, %c0_i32_1 : i32, i32, i32
  }
  func.func @transform_2(%arg0: i32, %arg1: i32) -> (i32, i32) {
    %c1_i32 = arith.constant 1 : i32
    %0 = arith.muli %arg0, %c1_i32 : i32
    %1 = arith.addi %0, %arg1 : i32
    %c0_i32 = arith.constant 0 : i32
    %c0_i32_0 = arith.constant 0 : i32
    return %1, %c0_i32 : i32, i32
  }
  func.func @transform_3(%arg0: i32, %arg1: i32) -> (i32, i32) {
    %c0_i32 = arith.constant 0 : i32
    %c0_i32_0 = arith.constant 0 : i32
    %c0_i32_1 = arith.constant 0 : i32
    return %c0_i32, %c0_i32_0 : i32, i32
  }
  func.func @transform_4(%arg0: i32, %arg1: i32) -> (i32, i32) {
    %c0_i32 = arith.constant 0 : i32
    %c0_i32_0 = arith.constant 0 : i32
    %c0_i32_1 = arith.constant 0 : i32
    return %c0_i32, %c0_i32_0 : i32, i32
  }
  func.func @transform_5(%arg0: i32, %arg1: i32) -> (i32, i32, i32) {
    %c0_i32 = arith.constant 0 : i32
    %c0_i32_0 = arith.constant 0 : i32
    %c0_i32_1 = arith.constant 0 : i32
    %c0_i32_2 = arith.constant 0 : i32
    return %c0_i32, %c0_i32_0, %c0_i32_1 : i32, i32, i32
  }
  func.func @transform_6(%arg0: i32, %arg1: i32) -> (i32, i32, i32) {
    %c0_i32 = arith.constant 0 : i32
    %c0_i32_0 = arith.constant 0 : i32
    %c0_i32_1 = arith.constant 0 : i32
    %c0_i32_2 = arith.constant 0 : i32
    return %c0_i32, %c0_i32_0, %c0_i32_1 : i32, i32, i32
  }
  func.func @transform_7(%arg0: i32, %arg1: i32) -> (i32, i32) {
    %c0_i32 = arith.constant 0 : i32
    %c0_i32_0 = arith.constant 0 : i32
    %c0_i32_1 = arith.constant 0 : i32
    return %c0_i32, %c0_i32_0 : i32, i32
  }
  func.func @transform_8(%arg0: i32, %arg1: i32) -> (i32, i32) {
    %c0_i32 = arith.constant 0 : i32
    %c0_i32_0 = arith.constant 0 : i32
    %c0_i32_1 = arith.constant 0 : i32
    return %c0_i32, %c0_i32_0 : i32, i32
  }
  func.func @transform_9(%arg0: i32, %arg1: i32) -> (i32, i32, i32) {
    %c0_i32 = arith.constant 0 : i32
    %c0_i32_0 = arith.constant 0 : i32
    %c0_i32_1 = arith.constant 0 : i32
    return %arg0, %c0_i32, %c0_i32_0 : i32, i32, i32
  }
  func.func @transform_10(%arg0: i32, %arg1: i32) -> (i32, i32, i32) {
    %c0_i32 = arith.constant 0 : i32
    %c0_i32_0 = arith.constant 0 : i32
    %c0_i32_1 = arith.constant 0 : i32
    return %arg0, %c0_i32, %c0_i32_0 : i32, i32, i32
  }
}

</mosaic_0001>

<bundles_post_ra>
// kernel: _forward_dense.1
= control target key start
LH: loop header
LB: loop body
LE: loop exit
PB: predicated region body
PF: predicated region fallthrough
CT: control target
= control target key end

     0   :  { %s2356_s15 = smov 0   ;;  %s2358_s16 = smov 0   ;;  %s2723_s0 = inlined_call_operand.vmem [shape: bf16[8,2,128], index: 0, kind: input, shape index: {}]   ;;  %s2724_s1 = inlined_call_operand.vmem [shape: bf16[2,8,128], index: 1, kind: input, shape index: {}]   ;;  %s2725_s2 = inlined_call_operand.vmem [shape: f32[128,8], index: 2, kind: input, shape index: {}]   ;;  %s2726_s3 = inlined_call_operand.vmem [shape: f32[1,128], index: 3, kind: input, shape index: {}]   ;;  %s2727_s4 = inlined_call_operand.vmem [shape: bf16[128,128], index: 4, kind: input, shape index: {}]   ;;  %s2728_s5 = inlined_call_operand.vmem [shape: bf16[3,128,128], index: 5, kind: input, shape index: {}]   ;;  %s2729_s6 = inlined_call_operand.vmem [shape: f32[3,1,128], index: 6, kind: input, shape index: {}]   ;;  %s2730_s7 = inlined_call_operand.vmem [shape: f32[1,128], index: 7, kind: input, shape index: {}]   ;;  %s2731_s8 = inlined_call_operand.<no memory space> [shape: f32[1,1], index: 8, kind: input, shape index: {}]   ;;  %s2732_s9 = inlined_call_operand.vmem [shape: f32[2,2,128], index: 9, kind: output, shape index: {0}]   ;;  %s2733_s10 = inlined_call_operand.vmem [shape: f32[2,16,3], index: 10, kind: output, shape index: {1}]  }
   0x1   :  { %v16_v0 = vstv %s2731_s8  ;;  %s2360_s17 = smov 0  }
   0x2   :  { %17 = vst [vmem:[#allocation2] sm:$0x1] %v16_v0 }
   0x3 LB: > { %s35_s8 = sadd.s32 1, %s2286_s16  ;;  %p1784_p0 = scmp.ge.s32.totalorder %s2290_s17, 1  ;;  %s2290_s17 = sphi %s2360_s17, %s23_s17   ;;  %s2286_s16 = sphi %s2358_s16, %s2735_s16   ;;  %s2282_s15 = sphi %s2356_s15, %s2734_s15  }
   0x4   : > { %p37_p1 = scmp.ge.s32.totalorder %s35_s8, 2  ;;  %p348_p2 = scmp.lt.s32.totalorder %s2290_s17, 3 }
   0x6   : > { %s2737_s8 = smov (%p37_p1, %s35_s8), 0  ;;  %p349_p3 = pnand %p1784_p0, %p348_p2 }
   0x7   : > { %s1786_s18 = sshll.u32 (!%p349_p3), %s2282_s15, 3  ;;  %s1785_s24 = sshll.u32 (!%p349_p3), %s2282_s15, 2 }
   0x8   : > { %352 = sbr.rel (%p349_p3) target bundleno = 1549 (0x60d), region = 56  ;;  %p405_p4 = scmp.lt.s32.totalorder (!%p349_p3), %s1786_s18, 15 }
   0x9   : > { %p398_p5 = scmp.lt.s32.totalorder (!%p349_p3), %s1785_s24, 7  ;;  %p411_p6 = scmp.lt.s32.totalorder (!%p349_p3), %s2282_s15, 1 }
   0xa   : > { %s2296_s27 = smov (!%p349_p3), 1  }
   0xd   : > { %v2292_v1 = vmov 0   ;;  %v2084_v2 = vld [vmem:[%s2727_s4 + $0x38] sm:$0xff]   ;;  %s2739_s18 = smov (!%p405_p4, %s1786_s18), 15  ;;  %v2085_v3 = vld [vmem:[%s2727_s4 + $0x30] sm:$0xff]   ;;  %v2086_v8 = vld [vmem:[%s2727_s4 + $0x28] sm:$0xff]   ;;  %s2741_s24 = smov (!%p398_p5, %s1785_s24), 7 }
   0xe   : > { %2081 = vset.pattern.permute.xlu1 %v2292_v1  ;;  %2080 = vset.pattern.permute.xlu0 %v2292_v1  ;;  %s1787_s23 = sshll.u32 %s2739_s18, 3  ;;  %v2087_v11 = vld [vmem:[%s2727_s4 + $0x20] sm:$0xff]   ;;  %v2088_v14 = vld [vmem:[%s2727_s4 + $0x18] sm:$0xff]   ;;  %v2089_v15 = vld [vmem:[%s2727_s4 + $0x10] sm:$0xff]   ;;  %s400_s28 = scalar_lea.vmem %s2723_s0, %s2741_s24  ;;  %vm1538_vm0 = vcmask 1041409   ;;  %vm426_vm1 = vcmask 23552  }
   0xf   : > { %1954 = vmatprep.subr.bf16.mxu0 %v2084_v2  ;;  %s2386_s26 = scalar_lea.vmem %s2725_s2, %s1787_s23  ;;  %v2090_v16 = vld [vmem:[%s2727_s4 + $0x8] sm:$0xff]   ;;  %v2091_v17 = vld [vmem:[%s2727_s4] sm:$0xff]   ;;  %s2743_s15 = smov (!%p411_p6, %s2282_s15), 1  ;;  %vm1649_vm2 = vcmask 39952  }
  0x10   : > { %1955 = vmatpush3.bf16.msra.mxu0 %v2084_v2  ;;  %v2389_v4 = vld [vmem:[%s2386_s26 + $0x10] sm:$0xff]  ;;  %v2392_v5 = vld [vmem:[%s2386_s26] sm:$0xff]  ;;  %v2397_v6 = vld [vmem:[%s2386_s26 + $0x18] sm:$0xff]  ;;  %s1788_s18 = sshll.u32 %s2743_s15, 1 }
  0x11   : > { %1956 = vmatprep.subr.bf16.mxu0 %v2085_v3  ;;  %450 = vperm.xlu1 %2081, %v2389_v4   ;;  %v2400_v7 = vld [vmem:[%s2386_s26 + $0x8] sm:$0xff]  ;;  %v2409_v10 = vld [vmem:[%s2386_s26 + $0x20] sm:$0xff]  ;;  %v2417_v12 = vld [vmem:[%s2386_s26 + $0x38] sm:$0xff]  ;;  %s2648_s21 = scalar_lea.vmem %s2732_s9, %s1788_s18 }
  0x12   : > { %440 = vperm.xlu0 %2080, %v2392_v5   ;;  %v2406_v9 = vld [vmem:[%s2386_s26 + $0x28] sm:$0xff]  ;;  %v2420_v13 = vld [vmem:[%s2386_s26 + $0x30] sm:$0xff]  ;;  %v1791_v18 = vld [vmem:[%s2726_s3] ss:$0 sm:$0xff] }
  0x14   : > { %1957 = vmatpush3.bf16.msra.mxu0 %v2085_v3 }
  0x15   : > { %1958 = vmatprep.subr.bf16.mxu0 %v2086_v8  ;;  %455 = vperm.xlu1 %2081, %v2397_v6  }
  0x16   : > { %445 = vperm.xlu0 %2080, %v2400_v7  }
  0x18   : > { %1959 = vmatpush3.bf16.msra.mxu0 %v2086_v8 }
  0x19   : > { %1960 = vmatprep.subr.bf16.mxu0 %v2087_v11  ;;  %465 = vperm.xlu1 %2081, %v2406_v9  }
  0x1a   : > { %460 = vperm.xlu0 %2080, %v2409_v10  }
  0x1c   : > { %1961 = vmatpush3.bf16.msra.mxu0 %v2087_v11 }
  0x1d   : > { %1962 = vmatprep.subr.bf16.mxu0 %v2088_v14  ;;  %475 = vperm.xlu1 %2081, %v2417_v12  }
  0x1e   : > { %470 = vperm.xlu0 %2080, %v2420_v13  }
  0x20   : > { %1963 = vmatpush3.bf16.msra.mxu0 %v2088_v14 }
  0x21   : > { %1964 = vmatprep.subr.bf16.mxu0 %v2089_v15 }
  0x24   : > { %1965 = vmatpush3.bf16.msra.mxu0 %v2089_v15  ;;  %v2092_v15 = vld [vmem:[%s2728_s5 + $0x38] sm:$0xff]  }
  0x25   : > { %1966 = vmatprep.subr.bf16.mxu0 %v2090_v16  ;;  %1978 = vmatprep.subr.bf16.mxu1 %v2092_v15 }
  0x26   : > { %1979 = vmatpush3.bf16.msra.mxu1 %v2092_v15 }
  0x28   : > { %1967 = vmatpush3.bf16.msra.mxu0 %v2090_v16  ;;  %v2093_v16 = vld [vmem:[%s2728_s5 + $0x30] sm:$0xff]  }
  0x29   : > { %1968 = vmatprep.subr.bf16.mxu0 %v2091_v17  ;;  %1980 = vmatprep.subr.bf16.mxu1 %v2093_v16 }
  0x2a   : > { %1981 = vmatpush3.bf16.msra.mxu1 %v2093_v16 }
  0x2c   : > { %1969 = vmatpush3.bf16.msra.mxu0 %v2091_v17  ;;  %v2094_v17 = vld [vmem:[%s2728_s5 + $0x28] sm:$0xff]  }
  0x2d   : > { %1982 = vmatprep.subr.bf16.mxu1 %v2094_v17 }
  0x2e   : > { %1983 = vmatpush3.bf16.msra.mxu1 %v2094_v17 }
  0x8c   : > { %v451_v19 = vpop.permute.xlu1 %450 }
  0x8d   : > { %v441_v20 = vpop.permute.xlu0 %440  ;;  %v486_v21 = vsub.f32 %v451_v19, %v1791_v18  ;;  %v2096_v19 = vld [vmem:[%s2728_s5 + $0x18] sm:$0xff]  }
  0x8e   : > { %v484_v22 = vsub.f32 %v441_v20, %v1791_v18  ;;  %v2097_v20 = vld [vmem:[%s2728_s5 + $0x10] sm:$0xff]  }
  0x8f   : > { %v494_v23 = vmul.f32 %v486_v21, %v486_v21  ;;  %v2098_v21 = vld [vmem:[%s2728_s5 + $0x8] sm:$0xff]  }
  0x90   : > { %v492_v24 = vmul.f32 %v484_v22, %v484_v22  ;;  %v456_v25 = vpop.permute.xlu1 %455  ;;  %v2099_v22 = vld [vmem:[%s2728_s5] sm:$0xff]  }
  0x91   : > { %v446_v26 = vpop.permute.xlu0 %445  ;;  %v502_v27 = vmul.f32 -0.78125, %v494_v23  ;;  %v487_v29 = vsub.f32 %v456_v25, %v1791_v18  ;;  %v2293_v23 = vmov 286326784   ;;  %v684_v25 = vlaneseq }
  0x92   : > { %v500_v28 = vmul.f32 -0.78125, %v492_v24  ;;  %v485_v30 = vsub.f32 %v446_v26, %v1791_v18  ;;  %v682_v24 = vunpack.c.l.s4 %v2293_v23 }
  0x93   : > { %v512_v31 = vmul.f32 1.442695, %v502_v27  ;;  %v495_v32 = vmul.f32 %v487_v29, %v487_v29  ;;  %v685_v27 = vshrl.u32 %v684_v25, 7  ;;  %v657_v29 = vld [vmem:[%s400_s28] sm:$0x1] }
  0x94   : > { %v493_v33 = vmul.f32 %v485_v30, %v485_v30  ;;  %v508_v34 = vmul.f32 1.442695, %v500_v28  ;;  %v466_v35 = vpop.permute.xlu1 %465  ;;  %v683_v26 = vunpack.c.0.s8 %v682_v24  ;;  %v658_v28 = vld [vmem:[%s400_s28 + $0x1] sm:$0x1] }
  0x95   : > { %v461_v36 = vpop.permute.xlu0 %460  ;;  %v503_v37 = vmul.f32 -0.78125, %v495_v32  ;;  %v489_v39 = vsub.f32 %v466_v35, %v1791_v18  ;;  %2116 = vpow2.f32 %v512_v31  ;;  %v1801_v30 = vpack.i.b16 %v658_v28, %v658_v28 }
  0x96   : > { %v501_v38 = vmul.f32 -0.78125, %v493_v33  ;;  %v488_v40 = vsub.f32 %v461_v36, %v1791_v18  ;;  %2118 = vpow2.f32 %v508_v34  ;;  %v686_v31 = vsub.s32 %v683_v26, %v685_v27 }
  0x97   : > { %v514_v41 = vmul.f32 1.442695, %v503_v37  ;;  %v497_v43 = vmul.f32 %v489_v39, %v489_v39  ;;  %v668_v32 = vunpack.i.h.s16 %v658_v28  ;;  %v1800_v33 = vpack.i.b16 %v657_v29, %v657_v29  ;;  %v660_v37 = vld [vmem:[%s400_s28 + $0x3] sm:$0x1] }
  0x98   : > { %v510_v42 = vmul.f32 1.442695, %v501_v38  ;;  %v496_v44 = vmul.f32 %v488_v40, %v488_v40  ;;  %v476_v45 = vpop.permute.xlu1 %475  ;;  %v666_v34 = vunpack.i.h.s16 %v657_v29  ;;  %v701_v35 = vrot.slane %v1801_v30, %v686_v31  ;;  %v659_v40 = vld [vmem:[%s400_s28 + $0x2] sm:$0x1]  ;;  %s1901_s28 = sshll.u32 %s2743_s15, 4  ;;  %s2297_s15 = smov 126  }
  0x99   : > { %v471_v46 = vpop.permute.xlu0 %470  ;;  %2120 = vpow2.f32 %v514_v41  ;;  %v505_v47 = vmul.f32 -0.78125, %v497_v43  ;;  %v491_v48 = vsub.f32 %v476_v45, %v1791_v18  ;;  %v676_v36 = vpack.i.b16 %v668_v32, %v668_v32  ;;  %s2692_s11 = scalar_lea.vmem %s2733_s10, %s1901_s28 }
  0x9a   : > { %v490_v49 = vsub.f32 %v471_v46, %v1791_v18  ;;  %2122 = vpow2.f32 %v510_v42  ;;  %v504_v50 = vmul.f32 -0.78125, %v496_v44  ;;  %v2095_v18 = vld [vmem:[%s2728_s5 + $0x20] sm:$0xff]   ;;  %v687_v38 = vrot.slane %v1800_v33, %v686_v31 }
  0x9b   : > { %v518_v51 = vmul.f32 1.442695, %v505_v47  ;;  %v499_v52 = vmul.f32 %v491_v48, %v491_v48  ;;  %1984 = vmatprep.subr.bf16.mxu1 %v2095_v18  ;;  %v674_v39 = vpack.i.b16 %v666_v34, %v666_v34  ;;  %v672_v41 = vunpack.i.h.s16 %v660_v37 }
  0x9c   : > { %v498_v53 = vmul.f32 %v490_v49, %v490_v49  ;;  %v516_v54 = vmul.f32 1.442695, %v504_v50  ;;  %1985 = vmatpush3.bf16.msra.mxu1 %v2095_v18  ;;  %v747_v42 = vunpack.c.l.bf16 %v701_v35  ;;  %v2469_v43 = vsub.s32 0, %v685_v27  ;;  %v1903_v50 = vld [vmem:[%s2724_s1] sm:$0xff]  }
  0x9d   : > { %2124 = vpow2.f32 %v518_v51  ;;  %v507_v55 = vmul.f32 -0.78125, %v499_v52  ;;  %1986 = vmatprep.subr.bf16.mxu1 %v2096_v19  ;;  %v708_v44 = vrot.slane %v676_v36, %v686_v31  ;;  %v1803_v45 = vpack.i.b16 %v660_v37, %v660_v37 }
  0x9e   : > { %v506_v56 = vmul.f32 -0.78125, %v498_v53  ;;  %2126 = vpow2.f32 %v516_v54  ;;  %v670_v46 = vunpack.i.h.s16 %v659_v40  ;;  %v745_v47 = vunpack.c.l.bf16 %v687_v38 }
  0x9f   : > { %v522_v57 = vmul.f32 1.442695, %v507_v55  ;;  %v694_v48 = vrot.slane %v674_v39, %v686_v31  ;;  %v1802_v49 = vpack.i.b16 %v659_v40, %v659_v40  ;;  %v680_v51 = vpack.i.b16 %v672_v41, %v672_v41 }
  0xa0   : > { %v520_v58 = vmul.f32 1.442695, %v506_v56  ;;  %1987 = vmatpush3.bf16.msra.mxu1 %v2096_v19  ;;  %v764_v52 = vrot.slane %v747_v42, %v2469_v43  ;;  %v748_v53 = vunpack.c.l.bf16 %v708_v44  ;;  %v729_v54 = vrot.slane %v1803_v45, %v686_v31 }
  0xa1   : > { %2128 = vpow2.f32 %v522_v57  ;;  %1988 = vmatprep.subr.bf16.mxu1 %v2097_v20  ;;  %v678_v55 = vpack.i.b16 %v670_v46, %v670_v46  ;;  %v1904_v56 = vunpack.c.l.bf16 %v1903_v50  ;;  %v756_v57 = vrot.slane %v745_v47, %v2469_v43 }
  0xa2   : > { %2130 = vpow2.f32 %v520_v58  ;;  %v2117_v59 = vpop.eup %2116  ;;  %v746_v58 = vunpack.c.l.bf16 %v694_v48 }
  0xa3   : > { %v2119_v60 = vpop.eup %2118 }
  0xa4   : > { %1989 = vmatpush3.bf16.msra.mxu1 %v2097_v20 }
  0xa5   : > { %1990 = vmatprep.subr.bf16.mxu1 %v2098_v21 }
  0xa6   : > { %v2121_v61 = vpop.eup %2120 }
  0xa7   : > { %v2123_v62 = vpop.eup %2122  ;;  %v525_v63 = vpack.c.bf16 %v2121_v61, %v2117_v59  ;;  %v715_v59 = vrot.slane %v1802_v49, %v686_v31  ;;  %v736_v61 = vrot.slane %v680_v51, %v686_v31 }
  0xa8   : > { %v524_v0 = vpack.c.bf16 %v2123_v62, %v2119_v60  ;;  %1991 = vmatpush3.bf16.msra.mxu1 %v2098_v21 }
  0xa9   : > { %1992 = vmatprep.subr.bf16.mxu1 %v2099_v22  ;;  %v749_v15 = vunpack.c.l.bf16 %v715_v59  ;;  %v752_v17 = vunpack.c.l.bf16 %v736_v61 }
  0xaa   : > { %v2125_v1 = vpop.eup %2124  ;;  %1970 = vmatprep.mubr.bf16.mxu0 %v524_v0  ;;  %v751_v0 = vunpack.c.l.bf16 %v729_v54 }
  0xab   : > { %v2127_v2 = vpop.eup %2126  ;;  %1971 = vmatmul.mubr.bf16.vlgmr.msra.gmra.mxu0 %v525_v63  ;;  %v768_v63 = vrot.slane %v748_v53, %v2469_v43  ;;  %v772_v27 = vrot.slane %v749_v15, %v2469_v43  ;;  %v784_v29 = vrot.slane %v752_v17, %v2469_v43 }
  0xac   : > { %v526_v3 = vpack.c.bf16 %v2125_v1, %v2127_v2  ;;  %1993 = vmatpush3.bf16.msra.mxu1 %v2099_v22  ;;  %v1905_v2 = vunpack.c.h.bf16 %v1903_v50  ;;  %v780_v21 = vrot.slane %v751_v0, %v2469_v43 }
  0xae   : > { %v2129_v8 = vpop.eup %2128  ;;  %1974 = vmatprep.mubr.bf16.mxu0 %v526_v3  ;;  %v722_v3 = vrot.slane %v678_v55, %v686_v31 }
  0xaf   : > { %v2131_v11 = vpop.eup %2130 }
  0xb0   : > { %v527_v14 = vpack.c.bf16 %v2129_v8, %v2131_v11  ;;  %v750_v23 = vunpack.c.l.bf16 %v722_v3 }
  0xb2   : > { %v776_v34 = vrot.slane %v750_v23, %v2469_v43 }
  0xb3   : > { %1975 = vmatmul.mubr.bf16.gmra.mxu0 %v527_v14  ;;  %v760_v14 = vrot.slane %v746_v58, %v2469_v43 }
 0x16b   : > { %v1972_v60 = vpop.f32.mrf.mxu0 }
 0x16c   : > { %v787_v62 = vadd.f32 %v1972_v60, %v764_v52 }
 0x16d   : > { %v626_v1 = vpop.f32.mrf.mxu0 }
 0x16e   : > { %v2477_v8 = vadd.f32 %v1904_v56, %v787_v62  ;;  %v785_v11 = vadd.f32 %v756_v57, %v626_v1 }
 0x16f   : > { %v1973_v16 = vpop.f32.mrf.mxu0 }
 0x170   : > { %v1806_v18 = vmul.f32 -1.442695, %v2477_v8  ;;  %v2481_v19 = vadd.f32 %v1904_v56, %v785_v11  ;;  %v788_v20 = vadd.f32 %v1973_v16, %v768_v63 }
 0x171   : > { %v629_v22 = vpop.f32.mrf.mxu0 }
 0x172   : > { %v1804_v24 = vmul.f32 -1.442695, %v2481_v19  ;;  %v800_v25 = vadd.f32 %v1905_v2, %v788_v20  ;;  %v786_v26 = vadd.f32 %v760_v14, %v629_v22  ;;  %2132 = vpow2.f32 %v1806_v18 }
 0x173   : > { %v1976_v28 = vpop.f32.mrf.mxu0 }
 0x174   : > { %2134 = vpow2.f32 %v1804_v24  ;;  %v1807_v30 = vmul.f32 -1.442695, %v800_v25  ;;  %v798_v31 = vadd.f32 %v1905_v2, %v786_v26  ;;  %v791_v32 = vadd.f32 %v1976_v28, %v780_v21 }
 0x175   : > { %v642_v33 = vpop.f32.mrf.mxu0 }
 0x176   : > { %2136 = vpow2.f32 %v1807_v30  ;;  %v1805_v35 = vmul.f32 -1.442695, %v798_v31  ;;  %v803_v36 = vadd.f32 %v1904_v56, %v791_v32  ;;  %v789_v37 = vadd.f32 %v772_v27, %v642_v33  ;;  %v2101_v30 = vld [vmem:[%s2728_s5 + $0x70] sm:$0xff]   ;;  %v2103_v32 = vld [vmem:[%s2728_s5 + $0x60] sm:$0xff]   ;;  %v2104_v33 = vld [vmem:[%s2728_s5 + $0x58] sm:$0xff]  }
 0x177   : > { %v1977_v38 = vpop.f32.mrf.mxu0 }
 0x178   : > { %2138 = vpow2.f32 %v1805_v35  ;;  %v1810_v39 = vmul.f32 -1.442695, %v803_v36  ;;  %v801_v40 = vadd.f32 %v1904_v56, %v789_v37  ;;  %v792_v41 = vadd.f32 %v1977_v38, %v784_v29  ;;  %v2100_v29 = vld [vmem:[%s2728_s5 + $0x78] sm:$0xff]   ;;  %v2106_v35 = vld [vmem:[%s2728_s5 + $0x48] sm:$0xff]   ;;  %v1812_v37 = vld [vmem:[%s2729_s6] ss:$0 sm:$0xff] }
 0x179   : > { %v645_v42 = vpop.f32.mrf.mxu0  ;;  %2002 = vmatprep.subr.bf16.mxu0 %v2100_v29 }
 0x17a   : > { %v1808_v44 = vmul.f32 -1.442695, %v801_v40  ;;  %v804_v45 = vadd.f32 %v1905_v2, %v792_v41  ;;  %v790_v46 = vadd.f32 %v776_v34, %v645_v42  ;;  %2140 = vpow2.f32 %v1810_v39  ;;  %2003 = vmatpush3.bf16.msra.mxu0 %v2100_v29  ;;  %v2105_v34 = vld [vmem:[%s2728_s5 + $0x50] sm:$0xff]  }
 0x17b   : > { %2004 = vmatprep.subr.bf16.mxu0 %v2101_v30 }
 0x17c   : > { %2142 = vpow2.f32 %v1808_v44  ;;  %v1811_v47 = vmul.f32 -1.442695, %v804_v45  ;;  %v802_v48 = vadd.f32 %v1905_v2, %v790_v46 }
 0x17e   : > { %2144 = vpow2.f32 %v1811_v47  ;;  %v1809_v49 = vmul.f32 -1.442695, %v802_v48  ;;  %2005 = vmatpush3.bf16.msra.mxu0 %v2101_v30 }
 0x17f   : > { %v2133_v43 = vpop.eup %2132 }
 0x180   : > { %2146 = vpow2.f32 %v1809_v49  ;;  %v831_v53 = vadd.f32 1.0, %v2133_v43 }
 0x181   : > { %v2135_v50 = vpop.eup %2134 }
 0x182   : > { %v829_v51 = vadd.f32 1.0, %v2135_v50 }
 0x183   : > { %v2137_v52 = vpop.eup %2136 }
 0x184   : > { %v832_v54 = vadd.f32 1.0, %v2137_v52  ;;  %2148 = vrcp.f32 %v829_v51 }
 0x185   : > { %v2139_v55 = vpop.eup %2138 }
 0x186   : > { %2150 = vrcp.f32 %v832_v54  ;;  %v830_v56 = vadd.f32 1.0, %v2139_v55 }
 0x187   : > { %2152 = vrcp.f32 %v831_v53  ;;  %v2141_v57 = vpop.eup %2140 }
 0x188   : > { %2154 = vrcp.f32 %v830_v56  ;;  %v835_v61 = vadd.f32 1.0, %v2141_v57 }
 0x189   : > { %v2143_v58 = vpop.eup %2142 }
 0x18a   : > { %v833_v59 = vadd.f32 1.0, %v2143_v58 }
 0x18b   : > { %v2145_v60 = vpop.eup %2144 }
 0x18c   : > { %v836_v62 = vadd.f32 1.0, %v2145_v60  ;;  %2156 = vrcp.f32 %v833_v59 }
 0x18d   : > { %v2147_v63 = vpop.eup %2146 }
 0x18e   : > { %2158 = vrcp.f32 %v836_v62  ;;  %v834_v0 = vadd.f32 1.0, %v2147_v63 }
 0x18f   : > { %2160 = vrcp.f32 %v835_v61 }
 0x190   : > { %2162 = vrcp.f32 %v834_v0 }
 0x191   : > { %v2149_v1 = vpop.eup %2148 }
 0x192   : > { %v2491_v15 = vmul.f32 %v2149_v1, %v2481_v19 }
 0x193   : > { %v2151_v2 = vpop.eup %2150 }
 0x194   : > { %v2153_v3 = vpop.eup %2152  ;;  %v2488_v14 = vmul.f32 %v2151_v2, %v800_v25 }
 0x195   : > { %v2155_v11 = vpop.eup %2154  ;;  %v2496_v17 = vmul.f32 %v2153_v3, %v2477_v8 }
 0x196   : > { %v2493_v16 = vmul.f32 %v2155_v11, %v798_v31  ;;  %v2102_v31 = vld [vmem:[%s2728_s5 + $0x68] sm:$0xff]  }
 0x197   : > { %v862_v20 = vpack.c.bf16 %v2488_v14, %v2496_v17  ;;  %2006 = vmatprep.subr.bf16.mxu0 %v2102_v31 }
 0x198   : > { %v861_v18 = vpack.c.bf16 %v2493_v16, %v2491_v15  ;;  %2007 = vmatpush3.bf16.msra.mxu0 %v2102_v31 }
 0x199   : > { %v2157_v21 = vpop.eup %2156  ;;  %2008 = vmatprep.subr.bf16.mxu0 %v2103_v32 }
 0x19a   : > { %1994 = vmatprep.mubr.bf16.mxu1 %v861_v18  ;;  %v2504_v19 = vmul.f32 %v2157_v21, %v801_v40 }
 0x19b   : > { %v2159_v22 = vpop.eup %2158  ;;  %1995 = vmatmul.mubr.bf16.vlgmr.msra.gmra.mxu1 %v862_v20 }
 0x19c   : > { %v2161_v23 = vpop.eup %2160  ;;  %v2502_v25 = vmul.f32 %v2159_v22, %v804_v45  ;;  %2009 = vmatpush3.bf16.msra.mxu0 %v2103_v32 }
 0x19d   : > { %v2163_v24 = vpop.eup %2162  ;;  %v2508_v8 = vmul.f32 %v2161_v23, %v803_v36  ;;  %2010 = vmatprep.subr.bf16.mxu0 %v2104_v33  ;;  %v2107_v36 = vld [vmem:[%s2728_s5 + $0x40] sm:$0xff]  }
 0x19e   : > { %v2506_v26 = vmul.f32 %v2163_v24, %v802_v48 }
 0x19f   : > { %v864_v28 = vpack.c.bf16 %v2502_v25, %v2508_v8 }
 0x1a0   : > { %v863_v27 = vpack.c.bf16 %v2506_v26, %v2504_v19  ;;  %2011 = vmatpush3.bf16.msra.mxu0 %v2104_v33 }
 0x1a1   : > { %2012 = vmatprep.subr.bf16.mxu0 %v2105_v34 }
 0x1a2   : > { %1998 = vmatprep.mubr.bf16.mxu1 %v863_v27 }
 0x1a3   : > { %1999 = vmatmul.mubr.bf16.gmra.mxu1 %v864_v28 }
 0x1a4   : > { %2013 = vmatpush3.bf16.msra.mxu0 %v2105_v34 }
 0x1a5   : > { %2014 = vmatprep.subr.bf16.mxu0 %v2106_v35 }
 0x1a8   : > { %2015 = vmatpush3.bf16.msra.mxu0 %v2106_v35 }
 0x1a9   : > { %2016 = vmatprep.subr.bf16.mxu0 %v2107_v36 }
 0x1ac   : > { %2017 = vmatpush3.bf16.msra.mxu0 %v2107_v36 }
 0x25b   : > { %v1996_v38 = vpop.f32.mrf.mxu1 }
 0x25c   : > { %v979_v39 = vadd.f32 %v1996_v38, %v1812_v37 }
 0x25d   : > { %v970_v40 = vpop.f32.mrf.mxu1 }
 0x25e   : > { %v1823_v41 = vmul.f32 -1.442695, %v979_v39  ;;  %v971_v42 = vadd.f32 %v1812_v37, %v970_v40 }
 0x25f   : > { %v1997_v44 = vpop.f32.mrf.mxu1 }
 0x260   : > { %2164 = vpow2.f32 %v1823_v41  ;;  %v1821_v45 = vmul.f32 -1.442695, %v971_v42  ;;  %v982_v46 = vadd.f32 %v1997_v44, %v1812_v37 }
 0x261   : > { %v973_v47 = vpop.f32.mrf.mxu1 }
 0x262   : > { %2166 = vpow2.f32 %v1821_v45  ;;  %v1824_v48 = vmul.f32 -1.442695, %v982_v46  ;;  %v974_v49 = vadd.f32 %v1812_v37, %v973_v47 }
 0x263   : > { %v2000_v43 = vpop.f32.mrf.mxu1 }
 0x264   : > { %2168 = vpow2.f32 %v1824_v48  ;;  %v1822_v50 = vmul.f32 -1.442695, %v974_v49  ;;  %v995_v51 = vadd.f32 %v2000_v43, %v1812_v37 }
 0x265   : > { %v986_v52 = vpop.f32.mrf.mxu1 }
 0x266   : > { %2170 = vpow2.f32 %v1822_v50  ;;  %v1827_v53 = vmul.f32 -1.442695, %v995_v51  ;;  %v987_v54 = vadd.f32 %v1812_v37, %v986_v52 }
 0x267   : > { %v2001_v55 = vpop.f32.mrf.mxu1 }
 0x268   : > { %2172 = vpow2.f32 %v1827_v53  ;;  %v1825_v56 = vmul.f32 -1.442695, %v987_v54  ;;  %v998_v57 = vadd.f32 %v2001_v55, %v1812_v37  ;;  %v2113_v55 = vld [vmem:[%s2728_s5 + $0x90] sm:$0xff]  }
 0x269   : > { %v989_v58 = vpop.f32.mrf.mxu1 }
 0x26a   : > { %2174 = vpow2.f32 %v1825_v56  ;;  %v1828_v59 = vmul.f32 -1.442695, %v998_v57  ;;  %v990_v60 = vadd.f32 %v1812_v37, %v989_v58  ;;  %v2114_v56 = vld [vmem:[%s2728_s5 + $0x88] sm:$0xff]   ;;  %v2294_v58 = vmov 1  }
 0x26b   : > { %2083 = vset.pattern.permute.xlu1 %v2294_v58  ;;  %2082 = vset.pattern.permute.xlu0 %v2294_v58 }
 0x26c   : > { %2176 = vpow2.f32 %v1828_v59  ;;  %v1826_v61 = vmul.f32 -1.442695, %v990_v60  ;;  %1482 = vperm.xlu1 %2083, %v2400_v7   ;;  %1478 = vperm.xlu0 %2082, %v2392_v5   ;;  %v1846_v59 = vld [vmem:[%s2729_s6 + $0x1] ss:$0 sm:$0xff] }
 0x26d   : > { %v2165_v62 = vpop.eup %2164 }
 0x26e   : > { %2178 = vpow2.f32 %v1826_v61  ;;  %v1027_v0 = vadd.f32 1.0, %v2165_v62 }
 0x26f   : > { %v2167_v63 = vpop.eup %2166 }
 0x270   : > { %v1025_v1 = vadd.f32 1.0, %v2167_v63  ;;  %1486 = vperm.xlu1 %2083, %v2389_v4   ;;  %1490 = vperm.xlu0 %2082, %v2397_v6  }
 0x271   : > { %v2169_v2 = vpop.eup %2168 }
 0x272   : > { %2180 = vrcp.f32 %v1025_v1  ;;  %v1028_v3 = vadd.f32 1.0, %v2169_v2 }
 0x273   : > { %v2171_v11 = vpop.eup %2170  ;;  %2182 = vrcp.f32 %v1027_v0 }
 0x274   : > { %2184 = vrcp.f32 %v1028_v3  ;;  %v1026_v18 = vadd.f32 1.0, %v2171_v11  ;;  %1494 = vperm.xlu1 %2083, %v2409_v10   ;;  %1498 = vperm.xlu0 %2082, %v2406_v9  }
 0x275   : > { %v2173_v20 = vpop.eup %2172 }
 0x276   : > { %2186 = vrcp.f32 %v1026_v18  ;;  %v1031_v22 = vadd.f32 1.0, %v2173_v20 }
 0x277   : > { %v2175_v21 = vpop.eup %2174 }
 0x278   : > { %v1029_v23 = vadd.f32 1.0, %v2175_v21  ;;  %1502 = vperm.xlu1 %2083, %v2420_v13   ;;  %1506 = vperm.xlu0 %2082, %v2417_v12  }
 0x279   : > { %v2177_v24 = vpop.eup %2176 }
 0x27a   : > { %2188 = vrcp.f32 %v1029_v23  ;;  %v1032_v27 = vadd.f32 1.0, %v2177_v24 }
 0x27b   : > { %v2179_v28 = vpop.eup %2178  ;;  %2190 = vrcp.f32 %v1031_v22 }
 0x27c   : > { %2192 = vrcp.f32 %v1032_v27  ;;  %v1030_v29 = vadd.f32 1.0, %v2179_v28 }
 0x27e   : > { %2194 = vrcp.f32 %v1030_v29 }
 0x27f   : > { %v2181_v30 = vpop.eup %2180 }
 0x280   : > { %v2183_v31 = vpop.eup %2182  ;;  %v1049_v33 = vmul.f32 %v2181_v30, %v971_v42 }
 0x281   : > { %v2185_v32 = vpop.eup %2184  ;;  %v1051_v36 = vmul.f32 %v2183_v31, %v979_v39 }
 0x282   : > { %v1052_v34 = vmul.f32 %v2185_v32, %v982_v46  ;;  %v2545_v40 = vadd.f32 %v1049_v33, %v2491_v15 }
 0x283   : > { %v2187_v35 = vpop.eup %2186  ;;  %v2551_v45 = vadd.f32 %v1051_v36, %v2496_v17 }
 0x284   : > { %v1050_v37 = vmul.f32 %v2187_v35, %v974_v49  ;;  %v2542_v38 = vadd.f32 %v1052_v34, %v2488_v14 }
 0x286   : > { %v2548_v41 = vadd.f32 %v1050_v37, %v2493_v16  ;;  %v1066_v39 = vpack.c.bf16 %v2542_v38, %v2551_v45 }
 0x287   : > { %v2189_v44 = vpop.eup %2188 }
 0x288   : > { %v2191_v47 = vpop.eup %2190  ;;  %v1065_v42 = vpack.c.bf16 %v2548_v41, %v2545_v40  ;;  %v1053_v14 = vmul.f32 %v2189_v44, %v987_v54  ;;  %v2112_v54 = vld [vmem:[%s2728_s5 + $0x98] sm:$0xff]  }
 0x289   : > { %v2193_v46 = vpop.eup %2192  ;;  %v1055_v49 = vmul.f32 %v2191_v47, %v995_v51 }
 0x28a   : > { %v1056_v48 = vmul.f32 %v2193_v46, %v998_v57  ;;  %2018 = vmatprep.mubr.bf16.mxu0 %v1065_v42  ;;  %v2561_v17 = vadd.f32 %v1053_v14, %v2504_v19  ;;  %v2109_v19 = vld [vmem:[%s2728_s5 + $0xb0] sm:$0xff]   ;;  %v2115_v57 = vld [vmem:[%s2728_s5 + $0x80] sm:$0xff]  }
 0x28b   : > { %v2195_v15 = vpop.eup %2194  ;;  %2019 = vmatmul.mubr.bf16.vlgmr.msra.gmra.mxu0 %v1066_v39  ;;  %v2567_v52 = vadd.f32 %v1055_v49, %v2508_v8  ;;  %v2111_v8 = vld [vmem:[%s2728_s5 + $0xa0] sm:$0xff]  }
 0x28c   : > { %v1054_v16 = vmul.f32 %v2195_v15, %v990_v60  ;;  %v2558_v43 = vadd.f32 %v1056_v48, %v2502_v25  ;;  %v2108_v25 = vld [vmem:[%s2728_s5 + $0xb8] sm:$0xff]  }
 0x28d   : > { %2026 = vmatprep.subr.bf16.mxu1 %v2108_v25 }
 0x28e   : > { %v2564_v50 = vadd.f32 %v1054_v16, %v2506_v26  ;;  %v1068_v51 = vpack.c.bf16 %v2558_v43, %v2567_v52  ;;  %2027 = vmatpush3.bf16.msra.mxu1 %v2108_v25  ;;  %v2110_v26 = vld [vmem:[%s2728_s5 + $0xa8] sm:$0xff]  }
 0x28f   : > { %2028 = vmatprep.subr.bf16.mxu1 %v2109_v19 }
 0x290   : > { %v1067_v53 = vpack.c.bf16 %v2564_v50, %v2561_v17 }
 0x292   : > { %2022 = vmatprep.mubr.bf16.mxu0 %v1067_v53  ;;  %2029 = vmatpush3.bf16.msra.mxu1 %v2109_v19 }
 0x293   : > { %2023 = vmatmul.mubr.bf16.gmra.mxu0 %v1068_v51  ;;  %2030 = vmatprep.subr.bf16.mxu1 %v2110_v26 }
 0x296   : > { %2031 = vmatpush3.bf16.msra.mxu1 %v2110_v26 }
 0x297   : > { %2032 = vmatprep.subr.bf16.mxu1 %v2111_v8 }
 0x29a   : > { %2033 = vmatpush3.bf16.msra.mxu1 %v2111_v8 }
 0x29b   : > { %2034 = vmatprep.subr.bf16.mxu1 %v2112_v54 }
 0x29e   : > { %2035 = vmatpush3.bf16.msra.mxu1 %v2112_v54 }
 0x29f   : > { %2036 = vmatprep.subr.bf16.mxu1 %v2113_v55 }
 0x2a2   : > { %2037 = vmatpush3.bf16.msra.mxu1 %v2113_v55 }
 0x2a3   : > { %2038 = vmatprep.subr.bf16.mxu1 %v2114_v56 }
 0x2a6   : > { %2039 = vmatpush3.bf16.msra.mxu1 %v2114_v56 }
 0x2a7   : > { %2040 = vmatprep.subr.bf16.mxu1 %v2115_v57 }
 0x2aa   : > { %2041 = vmatpush3.bf16.msra.mxu1 %v2115_v57 }
 0x34b   : > { %v2020_v60 = vpop.f32.mrf.mxu0 }
 0x34c   : > { %v1185_v7 = vadd.f32 %v2020_v60, %v1846_v59 }
 0x34d   : > { %v1176_v61 = vpop.f32.mrf.mxu0 }
 0x34e   : > { %v1857_v5 = vmul.f32 -1.442695, %v1185_v7  ;;  %v1177_v62 = vadd.f32 %v1846_v59, %v1176_v61 }
 0x34f   : > { %v2021_v4 = vpop.f32.mrf.mxu0 }
 0x350   : > { %2196 = vpow2.f32 %v1857_v5  ;;  %v1855_v6 = vmul.f32 -1.442695, %v1177_v62  ;;  %v1188_v63 = vadd.f32 %v2021_v4, %v1846_v59 }
 0x351   : > { %v1179_v10 = vpop.f32.mrf.mxu0 }
 0x352   : > { %2198 = vpow2.f32 %v1855_v6  ;;  %v1858_v9 = vmul.f32 -1.442695, %v1188_v63  ;;  %v1180_v0 = vadd.f32 %v1846_v59, %v1179_v10 }
 0x353   : > { %v2024_v13 = vpop.f32.mrf.mxu0 }
 0x354   : > { %2200 = vpow2.f32 %v1858_v9  ;;  %v1856_v12 = vmul.f32 -1.442695, %v1180_v0  ;;  %v1201_v1 = vadd.f32 %v2024_v13, %v1846_v59 }
 0x355   : > { %v1192_v2 = vpop.f32.mrf.mxu0 }
 0x356   : > { %2202 = vpow2.f32 %v1856_v12  ;;  %v1861_v3 = vmul.f32 -1.442695, %v1201_v1  ;;  %v1193_v11 = vadd.f32 %v1846_v59, %v1192_v2 }
 0x357   : > { %v2025_v18 = vpop.f32.mrf.mxu0 }
 0x358   : > { %2204 = vpow2.f32 %v1861_v3  ;;  %v1859_v20 = vmul.f32 -1.442695, %v1193_v11  ;;  %v1204_v21 = vadd.f32 %v2025_v18, %v1846_v59 }
 0x359   : > { %v1195_v22 = vpop.f32.mrf.mxu0 }
 0x35a   : > { %2206 = vpow2.f32 %v1859_v20  ;;  %v1862_v23 = vmul.f32 -1.442695, %v1204_v21  ;;  %v1196_v24 = vadd.f32 %v1846_v59, %v1195_v22 }
 0x35c   : > { %2208 = vpow2.f32 %v1862_v23  ;;  %v1860_v27 = vmul.f32 -1.442695, %v1196_v24 }
 0x35d   : > { %v2197_v28 = vpop.eup %2196 }
 0x35e   : > { %2210 = vpow2.f32 %v1860_v27  ;;  %v1233_v30 = vadd.f32 1.0, %v2197_v28 }
 0x35f   : > { %v2199_v29 = vpop.eup %2198 }
 0x360   : > { %v1231_v31 = vadd.f32 1.0, %v2199_v29 }
 0x361   : > { %v2201_v32 = vpop.eup %2200 }
 0x362   : > { %2212 = vrcp.f32 %v1231_v31  ;;  %v1234_v33 = vadd.f32 1.0, %v2201_v32 }
 0x363   : > { %v2203_v34 = vpop.eup %2202  ;;  %2214 = vrcp.f32 %v1233_v30 }
 0x364   : > { %2216 = vrcp.f32 %v1234_v33  ;;  %v1232_v35 = vadd.f32 1.0, %v2203_v34 }
 0x365   : > { %v2205_v36 = vpop.eup %2204 }
 0x366   : > { %2218 = vrcp.f32 %v1232_v35  ;;  %v1237_v44 = vadd.f32 1.0, %v2205_v36 }
 0x367   : > { %v2207_v37 = vpop.eup %2206 }
 0x368   : > { %v1235_v47 = vadd.f32 1.0, %v2207_v37 }
 0x369   : > { %v2209_v42 = vpop.eup %2208 }
 0x36a   : > { %2220 = vrcp.f32 %v1235_v47  ;;  %v1238_v46 = vadd.f32 1.0, %v2209_v42 }
 0x36b   : > { %v2211_v39 = vpop.eup %2210  ;;  %2222 = vrcp.f32 %v1237_v44 }
 0x36c   : > { %2224 = vrcp.f32 %v1238_v46  ;;  %v1236_v14 = vadd.f32 1.0, %v2211_v39 }
 0x36e   : > { %2226 = vrcp.f32 %v1236_v14 }
 0x36f   : > { %v2213_v48 = vpop.eup %2212 }
 0x370   : > { %v2215_v15 = vpop.eup %2214  ;;  %v1255_v16 = vmul.f32 %v2213_v48, %v1177_v62 }
 0x371   : > { %v2217_v49 = vpop.eup %2216  ;;  %v1257_v25 = vmul.f32 %v2215_v15, %v1185_v7 }
 0x372   : > { %v1258_v53 = vmul.f32 %v2217_v49, %v1188_v63  ;;  %v2612_v8 = vadd.f32 %v1255_v16, %v2545_v40  ;;  %v1483_v49 = vpop.permute.xlu1 %1482 }
 0x373   : > { %v2219_v51 = vpop.eup %2218  ;;  %v2618_v56 = vadd.f32 %v1257_v25, %v2551_v45 }
 0x374   : > { %v1256_v19 = vmul.f32 %v2219_v51, %v1180_v0  ;;  %v2609_v26 = vadd.f32 %v1258_v53, %v2542_v38 }
 0x376   : > { %v2615_v54 = vadd.f32 %v1256_v19, %v2548_v41  ;;  %v1272_v60 = vpack.c.bf16 %v2609_v26, %v2618_v56 }
 0x377   : > { %v2221_v55 = vpop.eup %2220 }
 0x378   : > { %v2223_v57 = vpop.eup %2222  ;;  %v1271_v58 = vpack.c.bf16 %v2615_v54, %v2612_v8  ;;  %v1259_v38 = vmul.f32 %v2221_v55, %v1193_v11  ;;  %v1479_v55 = vpop.permute.xlu0 %1478 }
 0x379   : > { %v2225_v59 = vpop.eup %2224  ;;  %v1261_v41 = vmul.f32 %v2223_v57, %v1201_v1 }
 0x37a   : > { %v1262_v40 = vmul.f32 %v2225_v59, %v1204_v21  ;;  %2042 = vmatprep.mubr.bf16.mxu1 %v1271_v58  ;;  %v2628_v5 = vadd.f32 %v1259_v38, %v2561_v17  ;;  %v1880_v17 = vld [vmem:[%s2729_s6 + $0x2] ss:$0 sm:$0xff]  ;;  %v1487_v58 = vpop.permute.xlu1 %1486 }
 0x37b   : > { %v2227_v7 = vpop.eup %2226  ;;  %2043 = vmatmul.mubr.bf16.vlgmr.msra.gmra.mxu1 %v1272_v60  ;;  %v2634_v4 = vadd.f32 %v1261_v41, %v2567_v52 }
 0x37c   : > { %v1260_v61 = vmul.f32 %v2227_v7, %v1196_v24  ;;  %v2625_v45 = vadd.f32 %v1262_v40, %v2558_v43  ;;  %v2295_v43 = vmov 0.0   ;;  %v1897_v7 = vld [vmem:[%s2730_s7] ss:$0 sm:$0xff] }
 0x37d   : > { %425 = vst [vmem:[%s2648_s21] sm:$0x3] %v2295_v43  ;;  %427 = vst.msk [vmem:[%s2692_s11] sm:$0xff] %vm426_vm1, %v2295_v43 }
 0x37e   : > { %v2631_v62 = vadd.f32 %v1260_v61, %v2564_v50  ;;  %v1274_v63 = vpack.c.bf16 %v2625_v45, %v2634_v4  ;;  %428 = vst.msk [vmem:[%s2692_s11 + $0x8] sm:$0xff] %vm426_vm1, %v2295_v43 }
 0x380   : > { %v1273_v6 = vpack.c.bf16 %v2631_v62, %v2628_v5 }
 0x382   : > { %2046 = vmatprep.mubr.bf16.mxu1 %v1273_v6 }
 0x383   : > { %2047 = vmatmul.mubr.bf16.gmra.mxu1 %v1274_v63 }
 0x43b   : > { %v2044_v50 = vpop.f32.mrf.mxu1 }
 0x43c   : > { %v1391_v52 = vadd.f32 %v2044_v50, %v1880_v17 }
 0x43d   : > { %v1382_v10 = vpop.f32.mrf.mxu1 }
 0x43e   : > { %v1891_v9 = vmul.f32 -1.442695, %v1391_v52  ;;  %v1383_v0 = vadd.f32 %v1880_v17, %v1382_v10  ;;  %v1495_v10 = vpop.permute.xlu1 %1494 }
 0x43f   : > { %v2045_v13 = vpop.f32.mrf.mxu1 }
 0x440   : > { %2228 = vpow2.f32 %v1891_v9  ;;  %v1889_v12 = vmul.f32 -1.442695, %v1383_v0  ;;  %v1394_v1 = vadd.f32 %v2045_v13, %v1880_v17 }
 0x441   : > { %v1385_v2 = vpop.f32.mrf.mxu1 }
 0x442   : > { %2230 = vpow2.f32 %v1889_v12  ;;  %v1892_v3 = vmul.f32 -1.442695, %v1394_v1  ;;  %v1386_v11 = vadd.f32 %v1880_v17, %v1385_v2 }
 0x443   : > { %v2048_v18 = vpop.f32.mrf.mxu1 }
 0x444   : > { %2232 = vpow2.f32 %v1892_v3  ;;  %v1890_v20 = vmul.f32 -1.442695, %v1386_v11  ;;  %v1407_v21 = vadd.f32 %v2048_v18, %v1880_v17 }
 0x445   : > { %v1398_v22 = vpop.f32.mrf.mxu1 }
 0x446   : > { %2234 = vpow2.f32 %v1890_v20  ;;  %v1895_v23 = vmul.f32 -1.442695, %v1407_v21  ;;  %v2655_v24 = vadd.f32 %v1880_v17, %v1398_v22 }
 0x447   : > { %v2049_v27 = vpop.f32.mrf.mxu1 }
 0x448   : > { %2236 = vpow2.f32 %v1895_v23  ;;  %v1893_v28 = vmul.f32 -1.442695, %v2655_v24  ;;  %v2658_v29 = vadd.f32 %v2049_v27, %v1880_v17  ;;  %v1503_v27 = vpop.permute.xlu1 %1502 }
 0x449   : > { %v1401_v30 = vpop.f32.mrf.mxu1 }
 0x44a   : > { %2238 = vpow2.f32 %v1893_v28  ;;  %v1896_v31 = vmul.f32 -1.442695, %v2658_v29  ;;  %v2661_v32 = vadd.f32 %v1880_v17, %v1401_v30  ;;  %v1491_v17 = vpop.permute.xlu0 %1490 }
 0x44c   : > { %2240 = vpow2.f32 %v1896_v31  ;;  %v1894_v33 = vmul.f32 -1.442695, %v2661_v32 }
 0x44d   : > { %v2229_v34 = vpop.eup %2228 }
 0x44e   : > { %v1439_v35 = vadd.f32 1.0, %v2229_v34  ;;  %2242 = vpow2.f32 %v1894_v33 }
 0x44f   : > { %v2231_v36 = vpop.eup %2230 }
 0x450   : > { %2244 = vrcp.f32 %v1439_v35  ;;  %v1437_v37 = vadd.f32 1.0, %v2231_v36 }
 0x451   : > { %v2233_v44 = vpop.eup %2232 }
 0x452   : > { %2246 = vrcp.f32 %v1437_v37  ;;  %v1440_v47 = vadd.f32 1.0, %v2233_v44 }
 0x453   : > { %v2235_v42 = vpop.eup %2234 }
 0x454   : > { %2248 = vrcp.f32 %v1440_v47  ;;  %v1438_v46 = vadd.f32 1.0, %v2235_v42 }
 0x455   : > { %v2237_v39 = vpop.eup %2236 }
 0x456   : > { %2250 = vrcp.f32 %v1438_v46  ;;  %v1443_v14 = vadd.f32 1.0, %v2237_v39 }
 0x457   : > { %v2239_v48 = vpop.eup %2238 }
 0x458   : > { %2252 = vrcp.f32 %v1443_v14  ;;  %v1441_v15 = vadd.f32 1.0, %v2239_v48 }
 0x459   : > { %v2241_v16 = vpop.eup %2240 }
 0x45a   : > { %2254 = vrcp.f32 %v1441_v15  ;;  %v1444_v53 = vadd.f32 1.0, %v2241_v16 }
 0x45b   : > { %v2243_v51 = vpop.eup %2242 }
 0x45c   : > { %2256 = vrcp.f32 %v1444_v53  ;;  %v1442_v25 = vadd.f32 1.0, %v2243_v51 }
 0x45d   : > { %v2245_v19 = vpop.eup %2244 }
 0x45e   : > { %v1463_v57 = vmul.f32 %v2245_v19, %v1391_v52  ;;  %2258 = vrcp.f32 %v1442_v25 }
 0x45f   : > { %v2247_v59 = vpop.eup %2246 }
 0x460   : > { %v1461_v60 = vmul.f32 %v2247_v59, %v1383_v0  ;;  %v1471_v38 = vadd.f32 %v1463_v57, %v2618_v56 }
 0x461   : > { %v2249_v40 = vpop.eup %2248 }
 0x462   : > { %v1464_v41 = vmul.f32 %v2249_v40, %v1394_v1  ;;  %v1511_v61 = vmul.f32 %v1487_v58, %v1471_v38  ;;  %v1469_v6 = vadd.f32 %v1461_v60, %v2612_v8  ;;  %v1517_v58 = vld [vmem:[%s2648_s21] sm:$0x3] }
 0x463   : > { %v2251_v63 = vpop.eup %2250  ;;  %v1898_v38 = vld [vmem:[#allocation2] ss:$0 sm:$0xff] }
 0x464   : > { %v1462_v50 = vmul.f32 %v2251_v63, %v1386_v11  ;;  %v1509_v52 = vmul.f32 %v1479_v55, %v1469_v6  ;;  %v1472_v9 = vadd.f32 %v1464_v41, %v2609_v26  ;;  %v1552_v13 = vmul.f32 %v1897_v7, %v1511_v61  ;;  %v1499_v11 = vpop.permute.xlu0 %1498 }
 0x465   : > { %v2253_v0 = vpop.eup %2252 }
 0x466   : > { %v1467_v12 = vmul.f32 %v2253_v0, %v1407_v21  ;;  %v1470_v56 = vadd.f32 %v1462_v50, %v2615_v54  ;;  %1562 = vadd.xlane.f32.xlu0 %v1552_v13  ;;  %v1512_v3 = vmul.f32 %v1491_v17, %v1472_v9  ;;  %v1550_v18 = vmul.f32 %v1897_v7, %v1509_v52  ;;  %v2260_v17 = vld [vmem:[%s2386_s26 + $0x10] sm:$0xff]  ;;  %v2262_v0 = vld [vmem:[%s2386_s26 + $0x20] sm:$0xff] }
 0x467   : > { %v2255_v2 = vpop.eup %2254  ;;  %v1518_v34 = vadd.f32 %v1511_v61, %v1509_v52 }
 0x468   : > { %v1465_v1 = vmul.f32 %v2255_v2, %v2655_v24  ;;  %v1510_v20 = vmul.f32 %v1483_v49, %v1470_v56  ;;  %v1475_v8 = vadd.f32 %v1467_v12, %v2634_v4  ;;  %1558 = vadd.xlane.f32.xlu1 %v1550_v18  ;;  %v1553_v30 = vmul.f32 %v1897_v7, %v1512_v3  ;;  %v1507_v36 = vpop.permute.xlu0 %1506  ;;  %v2263_v56 = vld [vmem:[%s2386_s26 + $0x18] sm:$0xff] }
 0x469   : > { %v2257_v22 = vpop.eup %2256 }
 0x46a   : > { %v1468_v23 = vmul.f32 %v2257_v22, %v2658_v29  ;;  %v1473_v26 = vadd.f32 %v1465_v1, %v2628_v5  ;;  %v1515_v28 = vmul.f32 %v1503_v27, %v1475_v8  ;;  %v1551_v54 = vmul.f32 %v1897_v7, %v1510_v20  ;;  %v2265_v22 = vld [vmem:[%s2386_s26 + $0x8] sm:$0xff] }
 0x46b   : > { %v2259_v21 = vpop.eup %2258  ;;  %v1527_v5 = vadd.f32 %v1512_v3, %v1510_v20  ;;  %v2264_v20 = vld [vmem:[%s2386_s26 + $0x30] sm:$0xff]  ;;  %v2266_v27 = vld [vmem:[%s2386_s26 + $0x28] sm:$0xff] }
 0x46c   : > { %v1466_v31 = vmul.f32 %v2259_v21, %v2661_v32  ;;  %v1513_v33 = vmul.f32 %v1495_v10, %v1473_v26  ;;  %1560 = vadd.xlane.f32.xlu0 %v1551_v54  ;;  %1564 = vadd.xlane.f32.xlu1 %v1553_v30  ;;  %v1476_v35 = vadd.f32 %v1468_v23, %v2625_v45  ;;  %v2261_v10 = vld [vmem:[%s2386_s26] sm:$0xff]  ;;  %v2267_v54 = vld [vmem:[%s2386_s26 + $0x38] sm:$0xff] }
 0x46d   : > { %v1556_v29 = vmul.f32 %v1897_v7, %v1515_v28 }
 0x46e   : > { %v1519_v24 = vadd.f32 %v1518_v34, %v1513_v33  ;;  %v1474_v4 = vadd.f32 %v1466_v31, %v2631_v62  ;;  %v1516_v46 = vmul.f32 %v1507_v36, %v1476_v35  ;;  %v1554_v32 = vmul.f32 %v1897_v7, %v1513_v33 }
 0x470   : > { %v1520_v37 = vadd.f32 %v1519_v24, %v1515_v28  ;;  %v1514_v44 = vmul.f32 %v1499_v11, %v1474_v4  ;;  %1570 = vadd.xlane.f32.xlu0 %v1556_v29  ;;  %v1557_v45 = vmul.f32 %v1897_v7, %v1516_v46 }
 0x472   : > { %v1521_v47 = vrot.slane %v1520_v37, 4  ;;  %v1528_v42 = vadd.f32 %v1527_v5, %v1514_v44  ;;  %v1555_v39 = vmul.f32 %v1897_v7, %v1514_v44 }
 0x474   : > { %v1522_v14 = vadd.f32 %v1521_v47, %v1520_v37  ;;  %v1529_v48 = vadd.f32 %v1528_v42, %v1516_v46  ;;  %1568 = vadd.xlane.f32.xlu1 %v1555_v39  ;;  %1566 = vadd.xlane.f32.xlu0 %v1554_v32 }
 0x476   : > { %v1523_v15 = vrot.slane %v1522_v14, 2  ;;  %v1530_v62 = vrot.slane %v1529_v48, 4 }
 0x478   : > { %v1524_v49 = vadd.f32 %v1523_v15, %v1522_v14  ;;  %v1531_v16 = vadd.f32 %v1530_v62, %v1529_v48  ;;  %1572 = vadd.xlane.f32.xlu1 %v1557_v45 }
 0x47a   : > { %v1532_v53 = vrot.slane %v1531_v16, 2  ;;  %v1525_v51 = vrot.slane %v1524_v49, 1 }
 0x47c   : > { %v1533_v25 = vadd.f32 %v1532_v53, %v1531_v16  ;;  %v1526_v55 = vadd.f32 %v1525_v51, %v1524_v49 }
 0x47e   : > { %v1534_v19 = vrot.slane %v1533_v25, 1 }
 0x480   : > { %v1535_v57 = vadd.f32 %v1534_v19, %v1533_v25 }
 0x482   : > { %v1539_v59 = vsel %vm1538_vm0, %v1535_v57, %v1526_v55 }
 0x483   : > { %v1541_v60 = vadd.f32 %v1539_v59, %v1517_v58 }
 0x485   : > { %1542 = vst [vmem:[%s2648_s21] sm:$0x3] %v1541_v60 }
 0x48a   : > { %1580 = vrot.lane.b32.xlu0 %v1898_v38, %s2296_s27  ;;  %v1647_v38 = vld [vmem:[%s2692_s11] sm:$0xff] }
 0x4ef   : > { %v1563_v40 = vpop.xlane.xlu0 %1562 }
 0x4f1   : > { %v1559_v6 = vpop.xlane.xlu1 %1558 }
 0x4f5   : > { %v1561_v7 = vpop.xlane.xlu0 %1560  ;;  %v1565_v3 = vpop.xlane.xlu1 %1564 }
 0x4f9   : > { %v1571_v41 = vpop.xlane.xlu0 %1570 }
 0x4fd   : > { %v1567_v61 = vpop.xlane.xlu0 %1566  ;;  %v1569_v28 = vpop.xlane.xlu1 %1568 }
 0x501   : > { %v1581_v63 = vpop.permute.xlu0 %1580  ;;  %v1573_v33 = vpop.xlane.xlu1 %1572 }
 0x502   : > { %v1585_v50 = vmul.f32 %v2260_v17, %v1581_v63  ;;  %v1583_v52 = vmul.f32 %v2261_v10, %v1581_v63  ;;  %v1587_v12 = vmul.f32 %v2262_v0, %v1581_v63  ;;  %v1586_v2 = vmul.f32 %v2263_v56, %v1581_v63 }
 0x503   : > { %v1589_v8 = vmul.f32 %v2264_v20, %v1581_v63  ;;  %v1584_v11 = vmul.f32 %v2265_v22, %v1581_v63  ;;  %v1588_v21 = vmul.f32 %v2266_v27, %v1581_v63  ;;  %v1590_v30 = vmul.f32 %v2267_v54, %v1581_v63 }
 0x504   : > { %v1593_v9 = vadd.f32 %v1585_v50, %v1563_v40  ;;  %v1591_v13 = vadd.f32 %v1583_v52, %v1559_v6  ;;  %v1595_v18 = vadd.f32 %v1587_v12, %v1567_v61  ;;  %v1594_v1 = vadd.f32 %v1586_v2, %v1565_v3 }
 0x505   : > { %v1597_v23 = vadd.f32 %v1589_v8, %v1571_v41  ;;  %v1592_v26 = vadd.f32 %v1584_v11, %v1561_v7  ;;  %v1596_v31 = vadd.f32 %v1588_v21, %v1569_v28  ;;  %v1598_v34 = vadd.f32 %v1590_v30, %v1573_v33  ;;  %v1648_v41 = vld [vmem:[%s2692_s11 + $0x8] sm:$0xff] }
 0x506   : > { %1611 = vperm.xlu0 %2082, %v1593_v9   ;;  %1601 = vperm.xlu1 %2083, %v1591_v13  }
 0x50a   : > { %1621 = vperm.xlu0 %2082, %v1595_v18   ;;  %1616 = vperm.xlu1 %2083, %v1594_v1  }
 0x50e   : > { %1631 = vperm.xlu0 %2082, %v1597_v23   ;;  %1606 = vperm.xlu1 %2083, %v1592_v26  }
 0x512   : > { %1626 = vperm.xlu1 %2083, %v1596_v31  }
 0x516   : > { %1636 = vperm.xlu1 %2083, %v1598_v34  }
 0x581   : > { %v1612_v24 = vpop.permute.xlu0 %1611  ;;  %v1602_v4 = vpop.permute.xlu1 %1601 }
 0x582   : > { %v1641_v35 = vmul.f32 %v2260_v17, %v1612_v24  ;;  %v1639_v36 = vmul.f32 %v2261_v10, %v1602_v4 }
 0x584   : > { %v1651_v5 = vsel %vm1649_vm2, %v1641_v35, 0.0  ;;  %v1650_v44 = vsel %vm1649_vm2, %v1639_v36, 0.0 }
 0x585   : > { %v1622_v29 = vpop.permute.xlu0 %1621  ;;  %v1617_v37 = vpop.permute.xlu1 %1616  ;;  %v1652_v46 = vadd.f32 %v1651_v5, %v1650_v44 }
 0x586   : > { %v1643_v47 = vmul.f32 %v2262_v0, %v1622_v29  ;;  %v1642_v15 = vmul.f32 %v2263_v56, %v1617_v37 }
 0x588   : > { %v1653_v42 = vsel %vm1649_vm2, %v1643_v47, 0.0  ;;  %v1658_v51 = vsel %vm1649_vm2, %v1642_v15, 0.0 }
 0x589   : > { %v1632_v39 = vpop.permute.xlu0 %1631  ;;  %v1607_v32 = vpop.permute.xlu1 %1606  ;;  %v1654_v43 = vadd.f32 %v1653_v42, %v1652_v46 }
 0x58a   : > { %v1645_v14 = vmul.f32 %v2264_v20, %v1632_v39  ;;  %v1640_v48 = vmul.f32 %v2265_v22, %v1607_v32 }
 0x58c   : > { %v1655_v62 = vsel %vm1649_vm2, %v1645_v14, 0.0  ;;  %v1657_v16 = vsel %vm1649_vm2, %v1640_v48, 0.0 }
 0x58d   : > { %v1656_v45 = vadd.f32 %v1655_v62, %v1654_v43  ;;  %v1627_v49 = vpop.permute.xlu1 %1626  ;;  %v1659_v19 = vadd.f32 %v1658_v51, %v1657_v16 }
 0x58e   : > { %v1644_v53 = vmul.f32 %v2266_v27, %v1627_v49 }
 0x58f   : > { %1666 = vrot.lane.b32.xlu0 %v1656_v45, %s2297_s15 }
 0x590   : > { %v1660_v25 = vsel %vm1649_vm2, %v1644_v53, 0.0 }
 0x591   : > { %v1637_v55 = vpop.permute.xlu1 %1636  ;;  %v1661_v58 = vadd.f32 %v1660_v25, %v1659_v19 }
 0x592   : > { %v1646_v57 = vmul.f32 %v2267_v54, %v1637_v55 }
 0x594   : > { %v1662_v59 = vsel %vm1649_vm2, %v1646_v57, 0.0 }
 0x595   : > { %v1663_v60 = vadd.f32 %v1662_v59, %v1661_v58 }
 0x597   : > { %1668 = vrot.lane.b32.xlu1 %v1663_v60, %s2297_s15 }
 0x601   : > { %v1667_v40 = vpop.permute.xlu0 %1666 }
 0x602   : > { %v1672_v7 = vadd.f32 %v1667_v40, %v1647_v38 }
 0x604   : > { %1675 = vst.msk [vmem:[%s2692_s11] sm:$0xff] %vm426_vm1, %v1672_v7 }
 0x609   : > { %v1669_v61 = vpop.permute.xlu1 %1668 }
 0x60a   : > { %v1673_v6 = vadd.f32 %v1669_v61, %v1648_v41 }
 0x60c   : > { %1676 = vst.msk [vmem:[%s2692_s11 + $0x8] sm:$0xff] %vm426_vm1, %v1673_v6 }
 0x60d PF: > { %s23_s17 = sadd.s32 1, %s2290_s17   ;;  %s2734_s15 = smov %s2286_s16 }
 0x60e   : > { %p20_p7 = scmp.ge.s32.totalorder %s23_s17, 4   ;;  %s2735_s16 = smov %s2737_s8 }
 0x610   :  { %22 = sbr.rel (!%p20_p7) target bundleno = 3 (0x3), region = 109 }

</bundles_post_ra>
